<compile_context>
chip_gen: v6e
topology: v6e:2x2x1
jax: 0.10.0
libtpu: 0.0.40
codegen_flags: <defaults>
</compile_context>

<pallas_src>
import jax
import jax.numpy as jnp
from jax.experimental import pallas as pl
from jax.experimental.pallas import tpu as pltpu

H_DIM = 32
NUM_HEADS = 4
HEAD_DIM = H_DIM // NUM_HEADS
INTER_DIM = 64
LN_EPS = 1e-5
OUT_LANES = 128          # lane-dense fused-output width
P_COLS = 8 * H_DIM       # 256: parameter-slab lane width


# ---------- shared math helper ----------
def _layer_norm(v, g, b):
    mu = jnp.mean(v, axis=-1, keepdims=True)
    var = jnp.mean((v - mu) ** 2, axis=-1, keepdims=True)
    return (v - mu) * jax.lax.rsqrt(var + LN_EPS) * g + b


# ---------- the fused Pallas kernel (single grid step, whole layer) ----------
def decoder_layer_kernel(act_ref, mask_ref, p_ref, out_ref):
    _, Nq, NqNx = mask_ref.shape          # (H, B*Sq, B*Sq + B*Sx)
    Nx = NqNx - Nq
    D, H, Hd, I = H_DIM, NUM_HEADS, HEAD_DIM, INTER_DIM

    act = act_ref[...]                    # (Nq+Nx, D)  = [yf ; xf]   (flattened tokens)
    msk = mask_ref[...]                   # (H, Nq, Nq+Nx)  block-diagonal-over-batch masks
    p = p_ref[...]                        # (D+7, 8*D)  parameter slab

    # --- unpack the parameter slab with static slices ---
    wqq  = p[:D, 0:2 * D]                 # [wq_s | wq_c]  (fused input projection)
    wq_c = p[:D, D:2 * D]
    wo_s = p[:D, 2 * D:3 * D]
    wo_c = p[:D, 3 * D:4 * D]
    w1   = p[:D, 4 * D:4 * D + I]
    w2t  = p[:D, 4 * D + I:4 * D + 2 * I]  # fc_2 weight stored transposed: (D, I)
    bqq  = p[D + 0:D + 1, 0:2 * D]        # [bq_s | bq_c]
    bq_c = p[D + 0:D + 1, D:2 * D]
    bo_s = p[D + 1:D + 2, 0:D]
    bo_c = p[D + 1:D + 2, D:2 * D]
    bf1  = p[D + 2:D + 3, 0:I]
    bf2  = p[D + 3:D + 4, 0:D]
    g1, b1 = p[D + 4:D + 5, 0:D], p[D + 4:D + 5, D:2 * D]
    g2, b2 = p[D + 5:D + 6, 0:D], p[D + 5:D + 6, D:2 * D]
    g3, b3 = p[D + 6:D + 7, 0:D], p[D + 6:D + 7, D:2 * D]

    inv_scale = 1.0 / (H_DIM ** 0.5)      # reference scales by sqrt(h_dim), not sqrt(head_dim)
    ymask = msk[:, :, :Nq]                # (H, Nq, Nq)
    xmask = msk[:, :, Nq:]                # (H, Nq, Nx)

    # head split/merge: lane slices + one stack / one concat, done ONCE per attention
    def split_heads(t2d):                 # (N, D) -> (H, N, Hd)
        return jnp.stack([t2d[:, h * Hd:(h + 1) * Hd] for h in range(H)], axis=0)

    def merge_heads(t3d):                 # (H, N, Hd) -> (N, D)
        return jnp.concatenate([t3d[h] for h in range(H)], axis=-1)

    def attend(qh, kvh, mask):
        """Head-batched attention over ALL batch elements at once.
        qh: (H, Nq', Hd); kvh: (H, Nk, Hd) serves as K and V (reference quirk);
        mask: (H, Nq', Nk) in {0,1}, zero outside the per-batch diagonal blocks, so
        cross-batch scores are masked to -1e9 and contribute exactly 0 after exp()."""
        s = jnp.einsum('hqd,hkd->hqk', qh * inv_scale, kvh,
                       preferred_element_type=jnp.float32)
        s = jnp.where(mask == 0.0, jnp.float32(-1e9), s)   # exact reference semantics
        s = s - jnp.max(s, axis=-1, keepdims=True)
        e = jnp.exp(s)
        prob = e * pl.reciprocal(jnp.sum(e, axis=-1, keepdims=True), approx=False)
        # TODO(synk): attention-probability dropout is identity (eval-mode forward).
        return jnp.einsum('hqk,hkd->hqd', prob, kvh, preferred_element_type=jnp.float32)

    # 0) fused input projections: [yf ; xf] @ [wq_s | wq_c]  (one MXU issue)
    proj = jnp.dot(act, wqq, preferred_element_type=jnp.float32) + bqq    # (Nq+Nx, 2D)
    yf  = act[:Nq]                        # (Nq, D)
    p_s = proj[:Nq, 0:D]                  # self-attn:  Q == K == V (shared query_fc)
    k_c = proj[Nq:, D:2 * D]              # cross-attn: K == V

    # 1) masked self-attention + residual + LayerNorm
    h_s = split_heads(p_s)
    ctx_s = merge_heads(attend(h_s, h_s, ymask))                          # (Nq, D)
    sa = jnp.dot(ctx_s, wo_s, preferred_element_type=jnp.float32) + bo_s
    y1 = _layer_norm(yf + sa, g1, b1)

    # 2) encoder-decoder (cross) attention + residual + LayerNorm
    q_c = jnp.dot(y1, wq_c, preferred_element_type=jnp.float32) + bq_c    # (Nq, D)
    attention = merge_heads(attend(split_heads(q_c), split_heads(k_c), xmask))  # (Nq, D)
    ca = jnp.dot(attention, wo_c, preferred_element_type=jnp.float32) + bo_c
    y2 = _layer_norm(y1 + ca, g2, b2)

    # 3) position-wise feed-forward + residual + LayerNorm  (fc_2 via transposed contraction)
    hdn = jnp.maximum(jnp.dot(y2, w1, preferred_element_type=jnp.float32) + bf1, 0.0)
    ff = jax.lax.dot_general(hdn, w2t, (((1,), (1,)), ((), ())),
                             preferred_element_type=jnp.float32) + bf2
    y3 = _layer_norm(y2 + ff, g3, b3)

    # 4) one lane-dense (128-wide) store: [y | attention | 0-pad]; split in the wrapper
    pad = jnp.zeros((Nq, OUT_LANES - 2 * D), jnp.float32)
    out_ref[...] = jnp.concatenate([y3, attention, pad], axis=-1).astype(out_ref.dtype)


# ---------- parameter coalescing (built ONCE at init, hoisted out of the call path) ----------
def pack_params(params):
    (wq_s, bq_s, wo_s, bo_s, g1, b1,
     wq_c, bq_c, wo_c, bo_c, g2, b2,
     w1, bf1, w2, bf2, g3, b3) = params
    w_rows = jnp.concatenate([wq_s, wq_c, wo_s, wo_c, w1, w2.T], axis=1)     # (D, 8D)

    def row(*vs):
        r = jnp.concatenate(vs, axis=1)
        return jnp.pad(r, ((0, 0), (0, P_COLS - r.shape[1])))

    vec_rows = jnp.concatenate([row(bq_s, bq_c), row(bo_s, bo_c), row(bf1), row(bf2),
                                row(g1, b1), row(g2, b2), row(g3, b3)], axis=0)  # (7, 8D)
    return jnp.concatenate([w_rows, vec_rows], axis=0)                       # (D+7, 8D)


# ---------- wrapper ----------
@jax.jit
def decoder_layer(y, y_mask, x, x_mask, param_slab):
    """y: (B,Sq,D); x: (B,Sx,D); y_mask broadcastable to (B,H,Sq,Sq);
    x_mask broadcastable to (B,H,Sq,Sx); param_slab = pack_params(params)."""
    B, Sq, D = y.shape
    _, Sx, _ = x.shape
    H = NUM_HEADS

    # per-call activation packing (one small fused XLA copy)
    act = jnp.concatenate([y.reshape(B * Sq, D), x.reshape(B * Sx, D)], axis=0)

    # head-broadcast + block-diagonal-over-batch masks, packed into a single slab
    eye = jnp.eye(B, dtype=jnp.float32)
    ym = jnp.broadcast_to(y_mask, (B, H, Sq, Sq)).astype(jnp.float32)
    xm = jnp.broadcast_to(x_mask, (B, H, Sq, Sx)).astype(jnp.float32)
    ybd = jnp.einsum('bhqk,bc->hbqck', ym, eye).reshape(H, B * Sq, B * Sq)
    xbd = jnp.einsum('bhqk,bc->hbqck', xm, eye).reshape(H, B * Sq, B * Sx)
    mask_slab = jnp.concatenate([ybd, xbd], axis=-1)             # (H, B*Sq, B*(Sq+Sx))

    vmem = pl.BlockSpec(memory_space=pltpu.MemorySpace.VMEM)
    out = pl.pallas_call(
        decoder_layer_kernel,
        out_shape=jax.ShapeDtypeStruct((B * Sq, OUT_LANES), jnp.float32),
        in_specs=[vmem, vmem, vmem],
        out_specs=vmem,
        # NOTE: single grid step — whole problem fits in VMEM on v5e/v6e/v7x.
        # TODO(synk): on v7x, add grid=(B,) with dimension_semantics=("parallel",) to use
        # both TensorCores.
    )(act, mask_slab, param_slab)

    out = out.reshape(B, Sq, OUT_LANES)
    return out[:, :, :D], out[:, :, D:2 * D]


# ---------- deterministic parameter init (shapes follow the module's __init__) ----------
def init_params(key):
    ks = jax.random.split(key, 8)

    def lin(k, din, dout):
        kw, kb = jax.random.split(k)
        w = jax.random.normal(kw, (din, dout), jnp.float32) * 0.05
        b = jax.random.normal(kb, (1, dout), jnp.float32) * 0.05
        return w, b

    wq_s, bq_s = lin(ks[0], H_DIM, H_DIM)    # self-attn query_fc (used for Q,K,V)
    wo_s, bo_s = lin(ks[1], H_DIM, H_DIM)    # self-attn out_fc
    wq_c, bq_c = lin(ks[2], H_DIM, H_DIM)    # cross-attn query_fc (used for Q,K,V)
    wo_c, bo_c = lin(ks[3], H_DIM, H_DIM)    # cross-attn out_fc
    w1, bf1 = lin(ks[4], H_DIM, INTER_DIM)   # ff fc_1
    w2, bf2 = lin(ks[5], INTER_DIM, H_DIM)   # ff fc_2
    g1 = jnp.ones((1, H_DIM), jnp.float32); b1 = jnp.zeros((1, H_DIM), jnp.float32)
    g2 = jnp.ones((1, H_DIM), jnp.float32); b2 = jnp.zeros((1, H_DIM), jnp.float32)
    g3 = jnp.ones((1, H_DIM), jnp.float32); b3 = jnp.zeros((1, H_DIM), jnp.float32)
    return [wq_s, bq_s, wo_s, bo_s, g1, b1,
            wq_c, bq_c, wo_c, bo_c, g2, b2,
            w1, bf1, w2, bf2, g3, b3]


# ---------- pure-JAX reference (same math as the torch module, no Pallas) ----------
def _ref_mha(q_in, kv_in, mask, wq, bq, wo, bo):
    B, Sq, _ = q_in.shape
    Sk = kv_in.shape[1]
    Q = q_in @ wq + bq
    K = kv_in @ wq + bq          # reference quirk: query_fc used for K and V too
    V = kv_in @ wq + bq
    Qh = Q.reshape(B, Sq, NUM_HEADS, HEAD_DIM).transpose(0, 2, 1, 3)
    Kh = K.reshape(B, Sk, NUM_HEADS, HEAD_DIM).transpose(0, 2, 1, 3)
    Vh = V.reshape(B, Sk, NUM_HEADS, HEAD_DIM).transpose(0, 2, 1, 3)
    s = jnp.einsum('bhqd,bhkd->bhqk', Qh, Kh) / jnp.sqrt(jnp.float32(H_DIM))
    s = jnp.where(mask == 0.0, jnp.float32(-1e9), s)
    p = jax.nn.softmax(s, axis=-1)
    ctx = jnp.einsum('bhqk,bhkd->bhqd', p, Vh)
    ctx = ctx.transpose(0, 2, 1, 3).reshape(B, Sq, H_DIM)
    return ctx @ wo + bo, ctx


def reference_decoder_layer(y, y_mask, x, x_mask, params):
    (wq_s, bq_s, wo_s, bo_s, g1, b1,
     wq_c, bq_c, wo_c, bo_c, g2, b2,
     w1, bf1, w2, bf2, g3, b3) = params
    sa, _ = _ref_mha(y, y, y_mask, wq_s, bq_s, wo_s, bo_s)
    y1 = _layer_norm(y + sa, g1, b1)
    ca, attention = _ref_mha(y1, x, x_mask, wq_c, bq_c, wo_c, bo_c)
    y2 = _layer_norm(y1 + ca, g2, b2)
    hdn = jnp.maximum(y2 @ w1 + bf1, 0.0)
    ff = hdn @ w2 + bf2
    return _layer_norm(y2 + ff, g3, b3), attention


if __name__ == "__main__":
    B, Sq, Sx = 2, 8, 16
    key = jax.random.PRNGKey(0)
    ky, kx, kp = jax.random.split(key, 3)

    y = jax.random.normal(ky, (B, Sq, H_DIM), jnp.float32)
    x = jax.random.normal(kx, (B, Sx, H_DIM), jnp.float32)
    # causal mask for decoder self-attention, (B, 1, Sq, Sq) broadcast over heads
    y_mask = jnp.broadcast_to(jnp.tril(jnp.ones((Sq, Sq), jnp.float32)), (B, 1, Sq, Sq))
    # encoder padding mask, (B, 1, 1, Sx): batch 1 has its last 3 source positions masked
    x_mask = jnp.ones((B, 1, 1, Sx), jnp.float32).at[1, 0, 0, Sx - 3:].set(0.0)

    params = init_params(kp)
    param_slab = pack_params(params)      # hoisted: built once, reused every call

    y_out, attention = decoder_layer(y, y_mask, x, x_mask, param_slab)
    jax.block_until_ready((y_out, attention))

    y_ref, attn_ref = reference_decoder_layer(y, y_mask, x, x_mask, params)
    assert jnp.allclose(y_out, y_ref, rtol=1e-4, atol=1e-4)
    assert jnp.allclose(attention, attn_ref, rtol=1e-4, atol=1e-4)

    print("KERNEL_OK")
</pallas_src>

<mosaic_0001>
module attributes {stable_mosaic.version = 11 : i64} {
  func.func @decoder_layer_kernel(%arg0: memref<48x32xf32, #tpu.memory_space<vmem>>, %arg1: memref<4x16x48xf32, #tpu.memory_space<vmem>>, %arg2: memref<39x256xf32, #tpu.memory_space<vmem>>, %arg3: memref<16x128xf32, #tpu.memory_space<vmem>>) attributes {dimension_semantics = [], scalar_prefetch = 0 : i64, scratch_operands = 0 : i64, tpu.core_type = #tpu.core_type<tc>} {
    %c0 = arith.constant 0 : index
    %c0_0 = arith.constant 0 : index
    %0 = vector.load %arg0[%c0, %c0_0] : memref<48x32xf32, #tpu.memory_space<vmem>>, vector<48x32xf32>
    %c0_1 = arith.constant 0 : index
    %c0_2 = arith.constant 0 : index
    %c0_3 = arith.constant 0 : index
    %1 = vector.load %arg1[%c0_1, %c0_2, %c0_3] : memref<4x16x48xf32, #tpu.memory_space<vmem>>, vector<4x16x48xf32>
    %c0_4 = arith.constant 0 : index
    %c0_5 = arith.constant 0 : index
    %2 = vector.load %arg2[%c0_4, %c0_5] : memref<39x256xf32, #tpu.memory_space<vmem>>, vector<39x256xf32>
    %3 = vector.extract_strided_slice %2 {offsets = [0, 0], sizes = [32, 64], strides = [1, 1]} : vector<39x256xf32> to vector<32x64xf32>
    %4 = vector.extract_strided_slice %2 {offsets = [0, 32], sizes = [32, 32], strides = [1, 1]} : vector<39x256xf32> to vector<32x32xf32>
    %5 = vector.extract_strided_slice %2 {offsets = [0, 64], sizes = [32, 32], strides = [1, 1]} : vector<39x256xf32> to vector<32x32xf32>
    %6 = vector.extract_strided_slice %2 {offsets = [0, 96], sizes = [32, 32], strides = [1, 1]} : vector<39x256xf32> to vector<32x32xf32>
    %7 = vector.extract_strided_slice %2 {offsets = [0, 128], sizes = [32, 64], strides = [1, 1]} : vector<39x256xf32> to vector<32x64xf32>
    %8 = vector.extract_strided_slice %2 {offsets = [0, 192], sizes = [32, 64], strides = [1, 1]} : vector<39x256xf32> to vector<32x64xf32>
    %9 = vector.extract_strided_slice %2 {offsets = [32, 0], sizes = [1, 64], strides = [1, 1]} : vector<39x256xf32> to vector<1x64xf32>
    %10 = vector.extract_strided_slice %2 {offsets = [32, 32], sizes = [1, 32], strides = [1, 1]} : vector<39x256xf32> to vector<1x32xf32>
    %11 = vector.extract_strided_slice %2 {offsets = [33, 0], sizes = [1, 32], strides = [1, 1]} : vector<39x256xf32> to vector<1x32xf32>
    %12 = vector.extract_strided_slice %2 {offsets = [33, 32], sizes = [1, 32], strides = [1, 1]} : vector<39x256xf32> to vector<1x32xf32>
    %13 = vector.extract_strided_slice %2 {offsets = [34, 0], sizes = [1, 64], strides = [1, 1]} : vector<39x256xf32> to vector<1x64xf32>
    %14 = vector.extract_strided_slice %2 {offsets = [35, 0], sizes = [1, 32], strides = [1, 1]} : vector<39x256xf32> to vector<1x32xf32>
    %15 = vector.extract_strided_slice %2 {offsets = [36, 0], sizes = [1, 32], strides = [1, 1]} : vector<39x256xf32> to vector<1x32xf32>
    %16 = vector.extract_strided_slice %2 {offsets = [36, 32], sizes = [1, 32], strides = [1, 1]} : vector<39x256xf32> to vector<1x32xf32>
    %17 = vector.extract_strided_slice %2 {offsets = [37, 0], sizes = [1, 32], strides = [1, 1]} : vector<39x256xf32> to vector<1x32xf32>
    %18 = vector.extract_strided_slice %2 {offsets = [37, 32], sizes = [1, 32], strides = [1, 1]} : vector<39x256xf32> to vector<1x32xf32>
    %19 = vector.extract_strided_slice %2 {offsets = [38, 0], sizes = [1, 32], strides = [1, 1]} : vector<39x256xf32> to vector<1x32xf32>
    %20 = vector.extract_strided_slice %2 {offsets = [38, 32], sizes = [1, 32], strides = [1, 1]} : vector<39x256xf32> to vector<1x32xf32>
    %21 = vector.extract_strided_slice %1 {offsets = [0, 0, 0], sizes = [4, 16, 16], strides = [1, 1, 1]} : vector<4x16x48xf32> to vector<4x16x16xf32>
    %22 = vector.extract_strided_slice %1 {offsets = [0, 0, 16], sizes = [4, 16, 32], strides = [1, 1, 1]} : vector<4x16x48xf32> to vector<4x16x32xf32>
    %cst = arith.constant dense<0.000000e+00> : vector<48x64xf32>
    %23 = tpu.matmul %0, %3, %cst {dimension_numbers = #tpu.dot_dimension_numbers<[1], [0], [0], [1], [0, 0, 1, 1], [], []>} : vector<48x32xf32>, vector<32x64xf32>, vector<48x64xf32> -> vector<48x64xf32>
    %24 = vector.broadcast %9 : vector<1x64xf32> to vector<48x64xf32>
    %25 = arith.addf %23, %24 : vector<48x64xf32>
    %26 = vector.extract_strided_slice %0 {offsets = [0, 0], sizes = [16, 32], strides = [1, 1]} : vector<48x32xf32> to vector<16x32xf32>
    %27 = vector.extract_strided_slice %25 {offsets = [0, 0], sizes = [16, 32], strides = [1, 1]} : vector<48x64xf32> to vector<16x32xf32>
    %28 = vector.extract_strided_slice %25 {offsets = [16, 32], sizes = [32, 32], strides = [1, 1]} : vector<48x64xf32> to vector<32x32xf32>
    %29 = vector.extract_strided_slice %27 {offsets = [0, 0], sizes = [16, 8], strides = [1, 1]} : vector<16x32xf32> to vector<16x8xf32>
    %30 = vector.extract_strided_slice %27 {offsets = [0, 8], sizes = [16, 8], strides = [1, 1]} : vector<16x32xf32> to vector<16x8xf32>
    %31 = vector.extract_strided_slice %27 {offsets = [0, 16], sizes = [16, 8], strides = [1, 1]} : vector<16x32xf32> to vector<16x8xf32>
    %32 = vector.extract_strided_slice %27 {offsets = [0, 24], sizes = [16, 8], strides = [1, 1]} : vector<16x32xf32> to vector<16x8xf32>
    %33 = vector.shape_cast %29 : vector<16x8xf32> to vector<1x16x8xf32>
    %34 = vector.shape_cast %30 : vector<16x8xf32> to vector<1x16x8xf32>
    %35 = vector.shape_cast %31 : vector<16x8xf32> to vector<1x16x8xf32>
    %36 = vector.shape_cast %32 : vector<16x8xf32> to vector<1x16x8xf32>
    %37 = tpu.concatenate %33, %34, %35, %36 in 0 : vector<1x16x8xf32>, vector<1x16x8xf32>, vector<1x16x8xf32>, vector<1x16x8xf32> -> vector<4x16x8xf32>
    %cst_6 = arith.constant 0.176776692 : f32
    %38 = vector.broadcast %cst_6 : f32 to vector<4x16x8xf32>
    %39 = arith.mulf %37, %38 : vector<4x16x8xf32>
    "tpu.trace_start"() <{level = 10 : i32, message = "hqd,hkd->hqk"}> : () -> ()
    %cst_7 = arith.constant dense<0.000000e+00> : vector<4x16x16xf32>
    %40 = tpu.matmul %39, %37, %cst_7 {dimension_numbers = #tpu.dot_dimension_numbers<[2], [2], [1], [1], [0, 0, 0, 1, 1, 1], [0], [0]>} : vector<4x16x8xf32>, vector<4x16x8xf32>, vector<4x16x16xf32> -> vector<4x16x16xf32>
    %cst_8 = arith.constant 0.000000e+00 : f32
    "tpu.trace_stop"() : () -> ()
    %41 = vector.broadcast %cst_8 : f32 to vector<4x16x16xf32>
    %42 = arith.cmpf oeq, %21, %41 : vector<4x16x16xf32>
    %cst_9 = arith.constant -1.000000e+09 : f32
    %43 = vector.broadcast %cst_9 : f32 to vector<4x16x16xf32>
    %44 = arith.select %42, %43, %40 : vector<4x16x16xi1>, vector<4x16x16xf32>
    %cst_10 = arith.constant dense<0xFF800000> : vector<4x16xf32>
    %45 = vector.multi_reduction <maximumf>, %44, %cst_10 [2] : vector<4x16x16xf32> to vector<4x16xf32>
    %46 = vector.shape_cast %45 : vector<4x16xf32> to vector<4x16x1xf32>
    %47 = vector.broadcast %46 : vector<4x16x1xf32> to vector<4x16x16xf32>
    %48 = arith.subf %44, %47 : vector<4x16x16xf32>
    %49 = math.exp %48 : vector<4x16x16xf32>
    %cst_11 = arith.constant dense<0.000000e+00> : vector<4x16xf32>
    %50 = vector.multi_reduction <add>, %49, %cst_11 [2] : vector<4x16x16xf32> to vector<4x16xf32>
    %51 = vector.shape_cast %50 : vector<4x16xf32> to vector<4x16x1xf32>
    %52 = tpu.reciprocal %51 : vector<4x16x1xf32> -> vector<4x16x1xf32>
    %53 = vector.broadcast %52 : vector<4x16x1xf32> to vector<4x16x16xf32>
    %54 = arith.mulf %49, %53 : vector<4x16x16xf32>
    "tpu.trace_start"() <{level = 10 : i32, message = "hqk,hkd->hqd"}> : () -> ()
    %cst_12 = arith.constant dense<0.000000e+00> : vector<4x16x8xf32>
    %55 = tpu.matmul %54, %37, %cst_12 {dimension_numbers = #tpu.dot_dimension_numbers<[2], [1], [1], [2], [0, 0, 0, 1, 1, 2], [0], [0]>} : vector<4x16x16xf32>, vector<4x16x8xf32>, vector<4x16x8xf32> -> vector<4x16x8xf32>
    "tpu.trace_stop"() : () -> ()
    %56 = vector.extract_strided_slice %55 {offsets = [0, 0, 0], sizes = [1, 16, 8], strides = [1, 1, 1]} : vector<4x16x8xf32> to vector<1x16x8xf32>
    %57 = vector.shape_cast %56 : vector<1x16x8xf32> to vector<16x8xf32>
    %58 = vector.extract_strided_slice %55 {offsets = [1, 0, 0], sizes = [1, 16, 8], strides = [1, 1, 1]} : vector<4x16x8xf32> to vector<1x16x8xf32>
    %59 = vector.shape_cast %58 : vector<1x16x8xf32> to vector<16x8xf32>
    %60 = vector.extract_strided_slice %55 {offsets = [2, 0, 0], sizes = [1, 16, 8], strides = [1, 1, 1]} : vector<4x16x8xf32> to vector<1x16x8xf32>
    %61 = vector.shape_cast %60 : vector<1x16x8xf32> to vector<16x8xf32>
    %62 = vector.extract_strided_slice %55 {offsets = [3, 0, 0], sizes = [1, 16, 8], strides = [1, 1, 1]} : vector<4x16x8xf32> to vector<1x16x8xf32>
    %63 = vector.shape_cast %62 : vector<1x16x8xf32> to vector<16x8xf32>
    %64 = tpu.concatenate %57, %59, %61, %63 in 1 : vector<16x8xf32>, vector<16x8xf32>, vector<16x8xf32>, vector<16x8xf32> -> vector<16x32xf32>
    %cst_13 = arith.constant dense<0.000000e+00> : vector<16x32xf32>
    %65 = tpu.matmul %64, %5, %cst_13 {dimension_numbers = #tpu.dot_dimension_numbers<[1], [0], [0], [1], [0, 0, 1, 1], [], []>} : vector<16x32xf32>, vector<32x32xf32>, vector<16x32xf32> -> vector<16x32xf32>
    %66 = vector.broadcast %11 : vector<1x32xf32> to vector<16x32xf32>
    %67 = arith.addf %65, %66 : vector<16x32xf32>
    %68 = arith.addf %26, %67 : vector<16x32xf32>
    %cst_14 = arith.constant dense<0.000000e+00> : vector<16xf32>
    %69 = vector.multi_reduction <add>, %68, %cst_14 [1] : vector<16x32xf32> to vector<16xf32>
    %70 = vector.shape_cast %69 : vector<16xf32> to vector<16x1xf32>
    %cst_15 = arith.constant 3.200000e+01 : f32
    %71 = vector.broadcast %cst_15 : f32 to vector<16x1xf32>
    %72 = arith.divf %70, %71 : vector<16x1xf32>
    %73 = vector.broadcast %72 : vector<16x1xf32> to vector<16x32xf32>
    %74 = arith.subf %68, %73 : vector<16x32xf32>
    %75 = arith.mulf %74, %74 : vector<16x32xf32>
    %cst_16 = arith.constant dense<0.000000e+00> : vector<16xf32>
    %76 = vector.multi_reduction <add>, %75, %cst_16 [1] : vector<16x32xf32> to vector<16xf32>
    %77 = vector.shape_cast %76 : vector<16xf32> to vector<16x1xf32>
    %cst_17 = arith.constant 3.200000e+01 : f32
    %78 = vector.broadcast %cst_17 : f32 to vector<16x1xf32>
    %79 = arith.divf %77, %78 : vector<16x1xf32>
    %80 = vector.broadcast %72 : vector<16x1xf32> to vector<16x32xf32>
    %81 = arith.subf %68, %80 : vector<16x32xf32>
    %cst_18 = arith.constant 9.99999974E-6 : f32
    %82 = vector.broadcast %cst_18 : f32 to vector<16x1xf32>
    %83 = arith.addf %79, %82 : vector<16x1xf32>
    %84 = math.rsqrt %83 : vector<16x1xf32>
    %85 = vector.broadcast %84 : vector<16x1xf32> to vector<16x32xf32>
    %86 = arith.mulf %81, %85 : vector<16x32xf32>
    %87 = vector.broadcast %15 : vector<1x32xf32> to vector<16x32xf32>
    %88 = arith.mulf %86, %87 : vector<16x32xf32>
    %89 = vector.broadcast %16 : vector<1x32xf32> to vector<16x32xf32>
    %90 = arith.addf %88, %89 : vector<16x32xf32>
    %cst_19 = arith.constant dense<0.000000e+00> : vector<16x32xf32>
    %91 = tpu.matmul %90, %4, %cst_19 {dimension_numbers = #tpu.dot_dimension_numbers<[1], [0], [0], [1], [0, 0, 1, 1], [], []>} : vector<16x32xf32>, vector<32x32xf32>, vector<16x32xf32> -> vector<16x32xf32>
    %92 = vector.broadcast %10 : vector<1x32xf32> to vector<16x32xf32>
    %93 = arith.addf %91, %92 : vector<16x32xf32>
    %94 = vector.extract_strided_slice %93 {offsets = [0, 0], sizes = [16, 8], strides = [1, 1]} : vector<16x32xf32> to vector<16x8xf32>
    %95 = vector.extract_strided_slice %93 {offsets = [0, 8], sizes = [16, 8], strides = [1, 1]} : vector<16x32xf32> to vector<16x8xf32>
    %96 = vector.extract_strided_slice %93 {offsets = [0, 16], sizes = [16, 8], strides = [1, 1]} : vector<16x32xf32> to vector<16x8xf32>
    %97 = vector.extract_strided_slice %93 {offsets = [0, 24], sizes = [16, 8], strides = [1, 1]} : vector<16x32xf32> to vector<16x8xf32>
    %98 = vector.shape_cast %94 : vector<16x8xf32> to vector<1x16x8xf32>
    %99 = vector.shape_cast %95 : vector<16x8xf32> to vector<1x16x8xf32>
    %100 = vector.shape_cast %96 : vector<16x8xf32> to vector<1x16x8xf32>
    %101 = vector.shape_cast %97 : vector<16x8xf32> to vector<1x16x8xf32>
    %102 = tpu.concatenate %98, %99, %100, %101 in 0 : vector<1x16x8xf32>, vector<1x16x8xf32>, vector<1x16x8xf32>, vector<1x16x8xf32> -> vector<4x16x8xf32>
    %103 = vector.extract_strided_slice %28 {offsets = [0, 0], sizes = [32, 8], strides = [1, 1]} : vector<32x32xf32> to vector<32x8xf32>
    %104 = vector.extract_strided_slice %28 {offsets = [0, 8], sizes = [32, 8], strides = [1, 1]} : vector<32x32xf32> to vector<32x8xf32>
    %105 = vector.extract_strided_slice %28 {offsets = [0, 16], sizes = [32, 8], strides = [1, 1]} : vector<32x32xf32> to vector<32x8xf32>
    %106 = vector.extract_strided_slice %28 {offsets = [0, 24], sizes = [32, 8], strides = [1, 1]} : vector<32x32xf32> to vector<32x8xf32>
    %107 = vector.shape_cast %103 : vector<32x8xf32> to vector<1x32x8xf32>
    %108 = vector.shape_cast %104 : vector<32x8xf32> to vector<1x32x8xf32>
    %109 = vector.shape_cast %105 : vector<32x8xf32> to vector<1x32x8xf32>
    %110 = vector.shape_cast %106 : vector<32x8xf32> to vector<1x32x8xf32>
    %111 = tpu.concatenate %107, %108, %109, %110 in 0 : vector<1x32x8xf32>, vector<1x32x8xf32>, vector<1x32x8xf32>, vector<1x32x8xf32> -> vector<4x32x8xf32>
    %cst_20 = arith.constant 0.176776692 : f32
    %112 = vector.broadcast %cst_20 : f32 to vector<4x16x8xf32>
    %113 = arith.mulf %102, %112 : vector<4x16x8xf32>
    "tpu.trace_start"() <{level = 10 : i32, message = "hqd,hkd->hqk"}> : () -> ()
    %cst_21 = arith.constant dense<0.000000e+00> : vector<4x16x32xf32>
    %114 = tpu.matmul %113, %111, %cst_21 {dimension_numbers = #tpu.dot_dimension_numbers<[2], [2], [1], [1], [0, 0, 0, 1, 1, 1], [0], [0]>} : vector<4x16x8xf32>, vector<4x32x8xf32>, vector<4x16x32xf32> -> vector<4x16x32xf32>
    %cst_22 = arith.constant 0.000000e+00 : f32
    "tpu.trace_stop"() : () -> ()
    %115 = vector.broadcast %cst_22 : f32 to vector<4x16x32xf32>
    %116 = arith.cmpf oeq, %22, %115 : vector<4x16x32xf32>
    %cst_23 = arith.constant -1.000000e+09 : f32
    %117 = vector.broadcast %cst_23 : f32 to vector<4x16x32xf32>
    %118 = arith.select %116, %117, %114 : vector<4x16x32xi1>, vector<4x16x32xf32>
    %cst_24 = arith.constant dense<0xFF800000> : vector<4x16xf32>
    %119 = vector.multi_reduction <maximumf>, %118, %cst_24 [2] : vector<4x16x32xf32> to vector<4x16xf32>
    %120 = vector.shape_cast %119 : vector<4x16xf32> to vector<4x16x1xf32>
    %121 = vector.broadcast %120 : vector<4x16x1xf32> to vector<4x16x32xf32>
    %122 = arith.subf %118, %121 : vector<4x16x32xf32>
    %123 = math.exp %122 : vector<4x16x32xf32>
    %cst_25 = arith.constant dense<0.000000e+00> : vector<4x16xf32>
    %124 = vector.multi_reduction <add>, %123, %cst_25 [2] : vector<4x16x32xf32> to vector<4x16xf32>
    %125 = vector.shape_cast %124 : vector<4x16xf32> to vector<4x16x1xf32>
    %126 = tpu.reciprocal %125 : vector<4x16x1xf32> -> vector<4x16x1xf32>
    %127 = vector.broadcast %126 : vector<4x16x1xf32> to vector<4x16x32xf32>
    %128 = arith.mulf %123, %127 : vector<4x16x32xf32>
    "tpu.trace_start"() <{level = 10 : i32, message = "hqk,hkd->hqd"}> : () -> ()
    %cst_26 = arith.constant dense<0.000000e+00> : vector<4x16x8xf32>
    %129 = tpu.matmul %128, %111, %cst_26 {dimension_numbers = #tpu.dot_dimension_numbers<[2], [1], [1], [2], [0, 0, 0, 1, 1, 2], [0], [0]>} : vector<4x16x32xf32>, vector<4x32x8xf32>, vector<4x16x8xf32> -> vector<4x16x8xf32>
    "tpu.trace_stop"() : () -> ()
    %130 = vector.extract_strided_slice %129 {offsets = [0, 0, 0], sizes = [1, 16, 8], strides = [1, 1, 1]} : vector<4x16x8xf32> to vector<1x16x8xf32>
    %131 = vector.shape_cast %130 : vector<1x16x8xf32> to vector<16x8xf32>
    %132 = vector.extract_strided_slice %129 {offsets = [1, 0, 0], sizes = [1, 16, 8], strides = [1, 1, 1]} : vector<4x16x8xf32> to vector<1x16x8xf32>
    %133 = vector.shape_cast %132 : vector<1x16x8xf32> to vector<16x8xf32>
    %134 = vector.extract_strided_slice %129 {offsets = [2, 0, 0], sizes = [1, 16, 8], strides = [1, 1, 1]} : vector<4x16x8xf32> to vector<1x16x8xf32>
    %135 = vector.shape_cast %134 : vector<1x16x8xf32> to vector<16x8xf32>
    %136 = vector.extract_strided_slice %129 {offsets = [3, 0, 0], sizes = [1, 16, 8], strides = [1, 1, 1]} : vector<4x16x8xf32> to vector<1x16x8xf32>
    %137 = vector.shape_cast %136 : vector<1x16x8xf32> to vector<16x8xf32>
    %138 = tpu.concatenate %131, %133, %135, %137 in 1 : vector<16x8xf32>, vector<16x8xf32>, vector<16x8xf32>, vector<16x8xf32> -> vector<16x32xf32>
    %cst_27 = arith.constant dense<0.000000e+00> : vector<16x32xf32>
    %139 = tpu.matmul %138, %6, %cst_27 {dimension_numbers = #tpu.dot_dimension_numbers<[1], [0], [0], [1], [0, 0, 1, 1], [], []>} : vector<16x32xf32>, vector<32x32xf32>, vector<16x32xf32> -> vector<16x32xf32>
    %140 = vector.broadcast %12 : vector<1x32xf32> to vector<16x32xf32>
    %141 = arith.addf %139, %140 : vector<16x32xf32>
    %142 = arith.addf %90, %141 : vector<16x32xf32>
    %cst_28 = arith.constant dense<0.000000e+00> : vector<16xf32>
    %143 = vector.multi_reduction <add>, %142, %cst_28 [1] : vector<16x32xf32> to vector<16xf32>
    %144 = vector.shape_cast %143 : vector<16xf32> to vector<16x1xf32>
    %cst_29 = arith.constant 3.200000e+01 : f32
    %145 = vector.broadcast %cst_29 : f32 to vector<16x1xf32>
    %146 = arith.divf %144, %145 : vector<16x1xf32>
    %147 = vector.broadcast %146 : vector<16x1xf32> to vector<16x32xf32>
    %148 = arith.subf %142, %147 : vector<16x32xf32>
    %149 = arith.mulf %148, %148 : vector<16x32xf32>
    %cst_30 = arith.constant dense<0.000000e+00> : vector<16xf32>
    %150 = vector.multi_reduction <add>, %149, %cst_30 [1] : vector<16x32xf32> to vector<16xf32>
    %151 = vector.shape_cast %150 : vector<16xf32> to vector<16x1xf32>
    %cst_31 = arith.constant 3.200000e+01 : f32
    %152 = vector.broadcast %cst_31 : f32 to vector<16x1xf32>
    %153 = arith.divf %151, %152 : vector<16x1xf32>
    %154 = vector.broadcast %146 : vector<16x1xf32> to vector<16x32xf32>
    %155 = arith.subf %142, %154 : vector<16x32xf32>
    %cst_32 = arith.constant 9.99999974E-6 : f32
    %156 = vector.broadcast %cst_32 : f32 to vector<16x1xf32>
    %157 = arith.addf %153, %156 : vector<16x1xf32>
    %158 = math.rsqrt %157 : vector<16x1xf32>
    %159 = vector.broadcast %158 : vector<16x1xf32> to vector<16x32xf32>
    %160 = arith.mulf %155, %159 : vector<16x32xf32>
    %161 = vector.broadcast %17 : vector<1x32xf32> to vector<16x32xf32>
    %162 = arith.mulf %160, %161 : vector<16x32xf32>
    %163 = vector.broadcast %18 : vector<1x32xf32> to vector<16x32xf32>
    %164 = arith.addf %162, %163 : vector<16x32xf32>
    %cst_33 = arith.constant dense<0.000000e+00> : vector<16x64xf32>
    %165 = tpu.matmul %164, %7, %cst_33 {dimension_numbers = #tpu.dot_dimension_numbers<[1], [0], [0], [1], [0, 0, 1, 1], [], []>} : vector<16x32xf32>, vector<32x64xf32>, vector<16x64xf32> -> vector<16x64xf32>
    %166 = vector.broadcast %13 : vector<1x64xf32> to vector<16x64xf32>
    %167 = arith.addf %165, %166 : vector<16x64xf32>
    %cst_34 = arith.constant 0.000000e+00 : f32
    %168 = vector.broadcast %cst_34 : f32 to vector<16x64xf32>
    %169 = arith.maximumf %167, %168 : vector<16x64xf32>
    %cst_35 = arith.constant dense<0.000000e+00> : vector<16x32xf32>
    %170 = tpu.matmul %169, %8, %cst_35 {dimension_numbers = #tpu.dot_dimension_numbers<[1], [1], [0], [0], [0, 0, 1, 0], [], []>} : vector<16x64xf32>, vector<32x64xf32>, vector<16x32xf32> -> vector<16x32xf32>
    %171 = vector.broadcast %14 : vector<1x32xf32> to vector<16x32xf32>
    %172 = arith.addf %170, %171 : vector<16x32xf32>
    %173 = arith.addf %164, %172 : vector<16x32xf32>
    %cst_36 = arith.constant dense<0.000000e+00> : vector<16xf32>
    %174 = vector.multi_reduction <add>, %173, %cst_36 [1] : vector<16x32xf32> to vector<16xf32>
    %175 = vector.shape_cast %174 : vector<16xf32> to vector<16x1xf32>
    %cst_37 = arith.constant 3.200000e+01 : f32
    %176 = vector.broadcast %cst_37 : f32 to vector<16x1xf32>
    %177 = arith.divf %175, %176 : vector<16x1xf32>
    %178 = vector.broadcast %177 : vector<16x1xf32> to vector<16x32xf32>
    %179 = arith.subf %173, %178 : vector<16x32xf32>
    %180 = arith.mulf %179, %179 : vector<16x32xf32>
    %cst_38 = arith.constant dense<0.000000e+00> : vector<16xf32>
    %181 = vector.multi_reduction <add>, %180, %cst_38 [1] : vector<16x32xf32> to vector<16xf32>
    %182 = vector.shape_cast %181 : vector<16xf32> to vector<16x1xf32>
    %cst_39 = arith.constant 3.200000e+01 : f32
    %183 = vector.broadcast %cst_39 : f32 to vector<16x1xf32>
    %184 = arith.divf %182, %183 : vector<16x1xf32>
    %185 = vector.broadcast %177 : vector<16x1xf32> to vector<16x32xf32>
    %186 = arith.subf %173, %185 : vector<16x32xf32>
    %cst_40 = arith.constant 9.99999974E-6 : f32
    %187 = vector.broadcast %cst_40 : f32 to vector<16x1xf32>
    %188 = arith.addf %184, %187 : vector<16x1xf32>
    %189 = math.rsqrt %188 : vector<16x1xf32>
    %190 = vector.broadcast %189 : vector<16x1xf32> to vector<16x32xf32>
    %191 = arith.mulf %186, %190 : vector<16x32xf32>
    %192 = vector.broadcast %19 : vector<1x32xf32> to vector<16x32xf32>
    %193 = arith.mulf %191, %192 : vector<16x32xf32>
    %194 = vector.broadcast %20 : vector<1x32xf32> to vector<16x32xf32>
    %195 = arith.addf %193, %194 : vector<16x32xf32>
    %cst_41 = arith.constant 0.000000e+00 : f32
    %196 = vector.broadcast %cst_41 : f32 to vector<16x64xf32>
    %197 = tpu.concatenate %195, %138, %196 in 1 : vector<16x32xf32>, vector<16x32xf32>, vector<16x64xf32> -> vector<16x128xf32>
    %c0_42 = arith.constant 0 : index
    %c0_43 = arith.constant 0 : index
    %198 = vector.load %arg3[%c0_42, %c0_43] : memref<16x128xf32, #tpu.memory_space<vmem>>, vector<16x128xf32>
    tpu.vector_store %arg3[%c0_42, %c0_43], %197 {strides = array<i32>} : memref<16x128xf32, #tpu.memory_space<vmem>>, vector<16x128xf32>,
    return
  }
}

</mosaic_0001>

<bundles_post_ra>
// kernel: decoder_layer.1
= control target key start
LH: loop header
LB: loop body
LE: loop exit
PB: predicated region body
PF: predicated region fallthrough
CT: control target
= control target key end

     0   :  { %vm41_vm0 = vcmask 261120   ;;  %v37_v10 = vlaneseq  ;;  %vm183_vm1 = vcmask 64512   ;;  %s3103_s7 = smov 120   ;;  %s3104_s8 = smov 104   ;;  %vm540_vm3 = vcmask 130048   ;;  %s3785_s2 = inlined_call_operand.vmem [shape: f32[39,256], index: 2, kind: input, shape index: {}]   ;;  %s3786_s0 = inlined_call_operand.vmem [shape: f32[48,32], index: 0, kind: input, shape index: {}]   ;;  %s3787_s1 = inlined_call_operand.vmem [shape: f32[4,16,48], index: 1, kind: input, shape index: {}]   ;;  %s3788_s3 = inlined_call_operand.vmem [shape: f32[16,128], index: 3, kind: output, shape index: {}]  }
   0x1   :  { %v3134_v0 = vld [vmem:[%s3785_s2 + $0x30] sm:$0xff]  ;;  %v3139_v1 = vld [vmem:[%s3785_s2 + $0x20] sm:$0xff]  ;;  %v3167_v5 = vld [vmem:[%s3786_s0 + $0x8] sm:$0xff]  ;;  %s3106_s25 = smov 8   ;;  %s3107_s26 = smov 16   ;;  %vm981_vm11 = vcmask 195584  }
   0x2   :  { %2796 = vmatprep.subr.mxu0 %v3134_v0  ;;  %v3145_v2 = vld [vmem:[%s3786_s0] sm:$0xff]  ;;  %v3151_v3 = vld [vmem:[%s3785_s2 + $0x10] sm:$0xff]  ;;  %v17_v7 = vld [vmem:[%s3786_s0 + $0x18] sm:$0xff]  ;;  %v3189_v11 = vshrl.u32 %v37_v10, 7  ;;  %s3108_s27 = smov 24   ;;  %s3109_s28 = smov 96  }
   0x3   :  { %2797 = vmatpush3.msra.mxu0 %v3134_v0  ;;  %2804 = vmatprep.mubr.msk.f32.mxu0 %vm41_vm0, %v3145_v2  ;;  %v3160_v4 = vld [vmem:[%s3785_s2] sm:$0xff]  ;;  %v16_v6 = vld [vmem:[%s3786_s0 + $0x10] sm:$0xff]  ;;  %v19_v9 = vld [vmem:[%s3786_s0 + $0x28] sm:$0xff]  ;;  %vm1707_vm12 = vcmask 392320   ;;  %s3110_s4 = smov 32   ;;  %vm2454_vm13 = vcmask 523264  }
   0x4   :  { %2798 = vmatprep.subr.mxu0 %v3139_v1  ;;  %v18_v8 = vld [vmem:[%s3786_s0 + $0x20] sm:$0xff]  ;;  %v39_v12 = vsub.s32 0, %v3189_v11  ;;  %s3102_s0 = smov 112   ;;  %v3262_v36 = vld [vmem:[%s3787_s1 + $0x8] sm:$0xff]  ;;  %v3282_v45 = vld [vmem:[%s3787_s1 + $0x18] sm:$0xff] }
   0x5   :  { %2799 = vmatpush3.msra.mxu0 %v3139_v1  ;;  %v3195_v13 = vld [vmem:[%s3785_s2 + $0x40] sm:$0x7f]  ;;  %vm525_vm2 = vcmp.eq.f32.partialorder %v3262_v36, 0.0  ;;  %v3287_v46 = vld [vmem:[%s3787_s1 + $0x10] sm:$0xff]  ;;  %vm527_vm5 = vcmp.eq.f32.partialorder %v3282_v45, 0.0  ;;  %v3296_v49 = vld [vmem:[%s3787_s1 + $0x28] sm:$0xff] }
   0x6   :  { %2800 = vmatprep.subr.mxu0 %v3151_v3  ;;  %v3198_v14 = vrot.slane %v3195_v13, %v39_v12  ;;  %v3269_v38 = vld [vmem:[%s3787_s1] sm:$0xff]  ;;  %vm526_vm6 = vcmp.eq.f32.partialorder %v3287_v46, 0.0  ;;  %vm529_vm7 = vcmp.eq.f32.partialorder %v3296_v49, 0.0  ;;  %v3311_v55 = vld [vmem:[%s3787_s1 + $0x38] sm:$0xff]  ;;  %v3316_v56 = vld [vmem:[%s3787_s1 + $0x30] sm:$0xff] }
   0x7   :  { %2801 = vmatpush3.msra.mxu0 %v3151_v3  ;;  %vm524_vm4 = vcmp.eq.f32.partialorder %v3269_v38, 0.0  ;;  %v3301_v50 = vld [vmem:[%s3787_s1 + $0x20] sm:$0xff]  ;;  %vm531_vm9 = vcmp.eq.f32.partialorder %v3311_v55, 0.0  ;;  %vm530_vm10 = vcmp.eq.f32.partialorder %v3316_v56, 0.0  ;;  %s3105_s1 = smov 64  }
   0x8   :  { %2802 = vmatprep.subr.mxu0 %v3160_v4  ;;  %vm528_vm8 = vcmp.eq.f32.partialorder %v3301_v50, 0.0 }
   0x9   :  { %2803 = vmatpush3.msra.mxu0 %v3160_v4 }
   0xa   :  { %2805 = vmatmul.mubr.msk.f32.vlgmr.msra.gmra.mxu0 %vm41_vm0, %v3167_v5 }
   0xb   :  { %2807 = vmatprep.mubr.msk.f32.mxu0 %vm41_vm0, %v16_v6 }
   0xe   :  { %2808 = vmatmul.mubr.msk.f32.gmra.mxu0 %vm41_vm0, %v17_v7 }
   0xf   :  { %2810 = vmatprep.mubr.msk.f32.mxu0 %vm41_vm0, %v18_v8 }
  0x12   :  { %2811 = vmatmul.mubr.msk.f32.gmra.mxu0 %vm41_vm0, %v19_v9 }
  0xca   :  { %v2806_v15 = vpop.f32.mrf.mxu0 }
  0xcb   :  { %v132_v16 = vadd.f32 %v2806_v15, %v3198_v14 }
  0xcc   :  { %v126_v17 = vpop.f32.mrf.mxu0 }
  0xcd   :  { %v127_v18 = vadd.f32 %v126_v17, %v3198_v14  ;;  %165 = vrot.lane.b32.xlu1 %v132_v16, %s3102_s0  ;;  %159 = vrot.lane.b32.xlu0 %v132_v16, %s3103_s7  ;;  %v176_v20 = vmul.f32 0.17677669, %v132_v16 }
  0xce   :  { %2813 = vmatprep.subr.msk.mxu0 %vm183_vm1, %v132_v16  ;;  %v3253_v33 = vpop.f32.mrf.mxu0 }
  0xcf   :  { %2814 = vmatpush3.xpose.msk.msra.mxu0 %vm183_vm1, %v132_v16  ;;  %v175_v19 = vmul.f32 0.17677669, %v127_v18 }
  0xd0   :  { %2815 = vmatprep.subr.msk.mxu0 %vm183_vm1, %v127_v18  ;;  %v3255_v34 = vpop.f32.mrf.mxu0 }
  0xd1   :  { %171 = vrot.lane.b32.xlu1 %v132_v16, %s3104_s8  ;;  %157 = vrot.lane.b32.xlu0 %v127_v18, %s3103_s7 }
  0xd2   :  { %2817 = vmatprep.mubr.msk.f32.mxu0 %vm183_vm1, %v175_v19  ;;  %v3257_v35 = vpop.f32.mrf.mxu0 }
  0xd3   :  { %2816 = vmatpush3.xpose.msk.msra.mxu0 %vm183_vm1, %v127_v18 }
  0xd4   :  { %v3264_v37 = vpop.f32.mrf.mxu0 }
  0xd5   :  { %169 = vrot.lane.b32.xlu1 %v127_v18, %s3104_s8  ;;  %163 = vrot.lane.b32.xlu0 %v127_v18, %s3102_s0 }
  0xd6   :  { %2818 = vmatmul.mubr.msk.f32.vlgmr.msra.gmra.mxu0 %vm183_vm1, %v176_v20 }
 0x13f   :  { %v166_v21 = vpop.permute.xlu1 %165  ;;  %v3214_v22 = vpop.permute.xlu0 %159 }
 0x140   :  { %2820 = vmatprep.subr.msk.mxu1 %vm183_vm1, %v3214_v22  ;;  %2827 = vmatprep.subr.msk.mxu0 %vm183_vm1, %v166_v21  ;;  %v178_v26 = vmul.f32 0.17677669, %v3214_v22  ;;  %v180_v31 = vmul.f32 0.17677669, %v166_v21 }
 0x141   :  { %2821 = vmatpush3.xpose.msk.msra.mxu1 %vm183_vm1, %v3214_v22  ;;  %2828 = vmatpush3.xpose.msk.msra.mxu0 %vm183_vm1, %v166_v21 }
 0x143   :  { %v3222_v23 = vpop.permute.xlu1 %171  ;;  %v3224_v24 = vpop.permute.xlu0 %157 }
 0x144   :  { %2822 = vmatprep.subr.msk.mxu1 %vm183_vm1, %v3224_v24  ;;  %v177_v25 = vmul.f32 0.17677669, %v3224_v24  ;;  %v182_v32 = vmul.f32 0.17677669, %v3222_v23 }
 0x145   :  { %2823 = vmatpush3.xpose.msk.msra.mxu1 %vm183_vm1, %v3224_v24 }
 0x146   :  { %2824 = vmatprep.mubr.msk.f32.mxu1 %vm183_vm1, %v177_v25  ;;  %2834 = vmatprep.subr.msk.mxu1 %vm183_vm1, %v3222_v23 }
 0x147   :  { %v3235_v27 = vpop.permute.xlu1 %169  ;;  %v164_v28 = vpop.permute.xlu0 %163 }
 0x148   :  { %2825 = vmatmul.mubr.msk.f32.vlgmr.msra.gmra.mxu1 %vm183_vm1, %v178_v26  ;;  %2829 = vmatprep.subr.msk.mxu0 %vm183_vm1, %v164_v28  ;;  %v179_v29 = vmul.f32 0.17677669, %v164_v28  ;;  %v181_v30 = vmul.f32 0.17677669, %v3235_v27 }
 0x149   :  { %2830 = vmatpush3.xpose.msk.msra.mxu0 %vm183_vm1, %v164_v28  ;;  %2835 = vmatpush3.xpose.msk.msra.mxu1 %vm183_vm1, %v3222_v23 }
 0x14a   :  { %2831 = vmatprep.mubr.msk.f32.mxu0 %vm183_vm1, %v179_v29  ;;  %2836 = vmatprep.subr.msk.mxu1 %vm183_vm1, %v3235_v27 }
 0x14b   :  { %2838 = vmatprep.mubr.msk.f32.mxu1 %vm183_vm1, %v181_v30  ;;  %2841 = vmatprep.subr.mxu0 %v132_v16 }
 0x14c   :  { %2832 = vmatmul.mubr.msk.f32.vlgmr.msra.gmra.mxu0 %vm183_vm1, %v180_v31 }
 0x14d   :  { %2837 = vmatpush3.xpose.msk.msra.mxu1 %vm183_vm1, %v3235_v27  ;;  %2842 = vmatpush3.msra.mxu0 %v132_v16 }
 0x14e   :  { %2843 = vmatprep.subr.mxu0 %v127_v18  ;;  %2855 = vmatprep.subr.mxu1 %v166_v21 }
 0x14f   :  { %2844 = vmatpush3.msra.mxu0 %v127_v18 }
 0x150   :  { %2839 = vmatmul.mubr.msk.f32.vlgmr.msra.gmra.mxu1 %vm183_vm1, %v182_v32  ;;  %2848 = vmatprep.subr.mxu0 %v3214_v22 }
 0x151   :  { %2856 = vmatpush3.msra.mxu1 %v166_v21 }
 0x152   :  { %2857 = vmatprep.subr.mxu1 %v164_v28 }
 0x153   :  { %2858 = vmatpush3.msra.mxu1 %v164_v28 }
 0x196   :  { %v2819_v39 = vpop.f32.mrf.mxu0 }
 0x197   :  { %v533_v40 = vsel %vm525_vm2, -1e+09, %v2819_v39 }
 0x198   :  { %v260_v41 = vpop.f32.mrf.mxu0  ;;  %v544_v42 = vsel %vm540_vm3, %v533_v40, -inf }
 0x199   :  { %v532_v43 = vsel %vm524_vm4, -1e+09, %v260_v41  ;;  %545 = vmax.xlane.f32.xlu1 %v544_v42 }
 0x19a   :  { %v541_v44 = vsel %vm540_vm3, %v532_v43, -inf }
 0x19b   :  { %542 = vmax.xlane.f32.xlu0 %v541_v44 }
 0x208   :  { %v2826_v47 = vpop.f32.mrf.mxu1 }
 0x209   :  { %v535_v48 = vsel %vm527_vm5, -1e+09, %v2826_v47 }
 0x20a   :  { %v345_v51 = vpop.f32.mrf.mxu1  ;;  %v550_v52 = vsel %vm540_vm3, %v535_v48, -inf }
 0x20b   :  { %v534_v53 = vsel %vm526_vm6, -1e+09, %v345_v51  ;;  %551 = vmax.xlane.f32.xlu0 %v550_v52 }
 0x20c   :  { %v2833_v54 = vpop.f32.mrf.mxu0  ;;  %v547_v58 = vsel %vm540_vm3, %v534_v53, -inf }
 0x20d   :  { %v537_v59 = vsel %vm529_vm7, -1e+09, %v2833_v54 }
 0x20e   :  { %v430_v57 = vpop.f32.mrf.mxu0  ;;  %v556_v6 = vsel %vm540_vm3, %v537_v59, -inf }
 0x20f   :  { %v536_v60 = vsel %vm528_vm8, -1e+09, %v430_v57  ;;  %548 = vmax.xlane.f32.xlu0 %v547_v58 }
 0x210   :  { %v2840_v61 = vpop.f32.mrf.mxu1  ;;  %v553_v62 = vsel %vm540_vm3, %v536_v60, -inf }
 0x211   :  { %554 = vmax.xlane.f32.xlu1 %v553_v62  ;;  %v539_v7 = vsel %vm531_vm9, -1e+09, %v2840_v61 }
 0x212   :  { %v515_v63 = vpop.f32.mrf.mxu1  ;;  %v562_v10 = vsel %vm540_vm3, %v539_v7, -inf }
 0x213   :  { %v538_v8 = vsel %vm530_vm10, -1e+09, %v515_v63  ;;  %557 = vmax.xlane.f32.xlu0 %v556_v6 }
 0x214   :  { %v559_v9 = vsel %vm540_vm3, %v538_v8, -inf }
 0x215   :  { %560 = vmax.xlane.f32.xlu1 %v559_v9 }
 0x217   :  { %563 = vmax.xlane.f32.xlu0 %v562_v10 }
 0x222   :  { %v546_v12 = vpop.xlane.xlu1 %545 }
 0x223   :  { %v566_v15 = vsub.f32 %v533_v40, %v546_v12 }
 0x224   :  { %v543_v16 = vpop.xlane.xlu0 %542 }
 0x225   :  { %v575_v17 = vmul.f32 1.442695, %v566_v15  ;;  %v565_v18 = vsub.f32 %v532_v43, %v543_v16 }
 0x227   :  { %3021 = vpow2.f32 %v575_v17  ;;  %v573_v19 = vmul.f32 1.442695, %v565_v18 }
 0x229   :  { %3023 = vpow2.f32 %v573_v19 }
 0x234   :  { %v3022_v20 = vpop.eup %3021 }
 0x235   :  { %v592_v21 = vsel %vm540_vm3, %v3022_v20, 0.0 }
 0x236   :  { %v3024_v25 = vpop.eup %3023  ;;  %593 = vadd.xlane.f32.xlu0 %v592_v21 }
 0x237   :  { %v589_v26 = vsel %vm540_vm3, %v3024_v25, 0.0 }
 0x238   :  { %590 = vadd.xlane.f32.xlu1 %v589_v26 }
 0x294   :  { %v552_v28 = vpop.xlane.xlu0 %551 }
 0x295   :  { %v568_v29 = vsub.f32 %v535_v48, %v552_v28 }
 0x297   :  { %v579_v30 = vmul.f32 1.442695, %v568_v29 }
 0x298   :  { %v549_v31 = vpop.xlane.xlu0 %548 }
 0x299   :  { %3025 = vpow2.f32 %v579_v30  ;;  %v567_v32 = vsub.f32 %v534_v53, %v549_v31 }
 0x29a   :  { %v555_v39 = vpop.xlane.xlu1 %554 }
 0x29b   :  { %v577_v40 = vmul.f32 1.442695, %v567_v32  ;;  %v569_v41 = vsub.f32 %v536_v60, %v555_v39 }
 0x29c   :  { %v558_v42 = vpop.xlane.xlu0 %557 }
 0x29d   :  { %3027 = vpow2.f32 %v577_v40  ;;  %v581_v43 = vmul.f32 1.442695, %v569_v41  ;;  %v570_v44 = vsub.f32 %v537_v59, %v558_v42 }
 0x29e   :  { %v561_v47 = vpop.xlane.xlu1 %560 }
 0x29f   :  { %3029 = vpow2.f32 %v581_v43  ;;  %v583_v51 = vmul.f32 1.442695, %v570_v44  ;;  %v571_v52 = vsub.f32 %v538_v8, %v561_v47 }
 0x2a0   :  { %v564_v54 = vpop.xlane.xlu0 %563 }
 0x2a1   :  { %3031 = vpow2.f32 %v583_v51  ;;  %v585_v57 = vmul.f32 1.442695, %v571_v52  ;;  %v572_v58 = vsub.f32 %v539_v7, %v564_v54 }
 0x2a3   :  { %3033 = vpow2.f32 %v585_v57  ;;  %v587_v48 = vmul.f32 1.442695, %v572_v58 }
 0x2a5   :  { %3035 = vpow2.f32 %v587_v48 }
 0x2a6   :  { %v3026_v61 = vpop.eup %3025 }
 0x2a7   :  { %v598_v53 = vsel %vm540_vm3, %v3026_v61, 0.0 }
 0x2a8   :  { %599 = vadd.xlane.f32.xlu0 %v598_v53 }
 0x2aa   :  { %v3028_v60 = vpop.eup %3027 }
 0x2ab   :  { %v595_v62 = vsel %vm540_vm3, %v3028_v60, 0.0 }
 0x2ac   :  { %v3030_v63 = vpop.eup %3029  ;;  %596 = vadd.xlane.f32.xlu1 %v595_v62 }
 0x2ad   :  { %v601_v8 = vsel %vm540_vm3, %v3030_v63, 0.0 }
 0x2ae   :  { %v3032_v59 = vpop.eup %3031 }
 0x2af   :  { %v604_v6 = vsel %vm540_vm3, %v3032_v59, 0.0 }
 0x2b0   :  { %v3034_v9 = vpop.eup %3033  ;;  %605 = vadd.xlane.f32.xlu0 %v604_v6  ;;  %602 = vadd.xlane.f32.xlu1 %v601_v8 }
 0x2b1   :  { %v607_v12 = vsel %vm540_vm3, %v3034_v9, 0.0 }
 0x2b2   :  { %v3036_v7 = vpop.eup %3035 }
 0x2b3   :  { %v610_v10 = vsel %vm540_vm3, %v3036_v7, 0.0 }
 0x2b4   :  { %611 = vadd.xlane.f32.xlu0 %v610_v10  ;;  %608 = vadd.xlane.f32.xlu1 %v607_v12 }
 0x2bf   :  { %v594_v15 = vpop.xlane.xlu0 %593 }
 0x2c0   :  { %3037 = vrcp.f32 %v594_v15 }
 0x2c1   :  { %v591_v16 = vpop.xlane.xlu1 %590 }
 0x2c2   :  { %3039 = vrcp.f32 %v591_v16 }
 0x2c5   :  { %998 = vrot.lane.b32.xlu1 %v3134_v0, %s3105_s1 }
 0x2c9   :  { %994 = vrot.lane.b32.xlu1 %v3151_v3, %s3105_s1 }
 0x2ca   :  { %996 = vrot.lane.b32.xlu0 %v3139_v1, %s3105_s1 }
 0x2cd   :  { %v3038_v17 = vpop.eup %3037 }
 0x2ce   :  { %v622_v21 = vmul.f32 %v3038_v17, %v3022_v20 }
 0x2cf   :  { %v3040_v18 = vpop.eup %3039 }
 0x2d0   :  { %v621_v19 = vmul.f32 %v3040_v18, %v3024_v25 }
 0x2d2   :  { %2845 = vmatprep.mubr.msk.f32.mxu0 %vm540_vm3, %v621_v19 }
 0x2d3   :  { %2846 = vmatmul.mubr.msk.f32.vlgmr.msra.gmra.mxu0 %vm540_vm3, %v622_v21  ;;  %v986_v21 = vsub.s32 1, %v3189_v11 }
 0x2d4   :  { %2849 = vmatpush3.msra.mxu0 %v3214_v22 }
 0x2d5   :  { %2850 = vmatprep.subr.mxu0 %v3224_v24 }
 0x2d6   :  { %2851 = vmatpush3.msra.mxu0 %v3224_v24 }
 0x2d7   :  { %2862 = vmatprep.subr.mxu0 %v3222_v23 }
 0x331   :  { %v600_v20 = vpop.xlane.xlu0 %599 }
 0x332   :  { %3041 = vrcp.f32 %v600_v20  ;;  %v3380_v20 = vrot.slane %v3195_v13, %v986_v21 }
 0x335   :  { %v597_v25 = vpop.xlane.xlu1 %596 }
 0x336   :  { %3043 = vrcp.f32 %v597_v25 }
 0x339   :  { %v606_v22 = vpop.xlane.xlu0 %605  ;;  %v603_v26 = vpop.xlane.xlu1 %602 }
 0x33a   :  { %3045 = vrcp.f32 %v606_v22 }
 0x33b   :  { %3047 = vrcp.f32 %v603_v26 }
 0x33d   :  { %v612_v24 = vpop.xlane.xlu0 %611  ;;  %v609_v28 = vpop.xlane.xlu1 %608 }
 0x33e   :  { %3049 = vrcp.f32 %v612_v24 }
 0x33f   :  { %3051 = vrcp.f32 %v609_v28  ;;  %v3042_v29 = vpop.eup %3041 }
 0x340   :  { %v624_v32 = vmul.f32 %v3042_v29, %v3026_v61 }
 0x341   :  { %v999_v52 = vpop.permute.xlu1 %998 }
 0x342   :  { %2869 = vmatprep.subr.mxu1 %v999_v52 }
 0x343   :  { %v3044_v30 = vpop.eup %3043 }
 0x344   :  { %v623_v31 = vmul.f32 %v3044_v30, %v3028_v60 }
 0x345   :  { %v995_v54 = vpop.permute.xlu1 %994 }
 0x346   :  { %2852 = vmatprep.mubr.msk.f32.mxu0 %vm540_vm3, %v623_v31 }
 0x347   :  { %v3046_v39 = vpop.eup %3045  ;;  %2853 = vmatmul.mubr.msk.f32.vlgmr.msra.gmra.mxu0 %vm540_vm3, %v624_v32  ;;  %v1116_v32 = vsub.s32 4, %v3189_v11 }
 0x348   :  { %v3048_v40 = vpop.eup %3047  ;;  %2863 = vmatpush3.msra.mxu0 %v3222_v23  ;;  %v626_v41 = vmul.f32 %v3046_v39, %v3032_v59  ;;  %v997_v23 = vpop.permute.xlu0 %996 }
 0x349   :  { %2864 = vmatprep.subr.mxu0 %v3235_v27  ;;  %v625_v42 = vmul.f32 %v3048_v40, %v3030_v63  ;;  %v3394_v39 = vrot.slane %v3195_v13, %v1116_v32 }
 0x34a   :  { %2865 = vmatpush3.msra.mxu0 %v3235_v27 }
 0x34b   :  { %v3050_v43 = vpop.eup %3049  ;;  %2859 = vmatprep.mubr.msk.f32.mxu1 %vm540_vm3, %v625_v42 }
 0x34c   :  { %v3052_v44 = vpop.eup %3051  ;;  %2860 = vmatmul.mubr.msk.f32.vlgmr.msra.gmra.mxu1 %vm540_vm3, %v626_v41  ;;  %v628_v47 = vmul.f32 %v3050_v43, %v3036_v7 }
 0x34d   :  { %v627_v51 = vmul.f32 %v3052_v44, %v3034_v9  ;;  %2870 = vmatpush3.msra.mxu1 %v999_v52 }
 0x34e   :  { %2871 = vmatprep.subr.mxu1 %v997_v23 }
 0x34f   :  { %2866 = vmatprep.mubr.msk.f32.mxu0 %vm540_vm3, %v627_v51  ;;  %2872 = vmatpush3.msra.mxu1 %v997_v23 }
 0x350   :  { %2867 = vmatmul.mubr.msk.f32.vlgmr.msra.gmra.mxu0 %vm540_vm3, %v628_v47  ;;  %2873 = vmatprep.subr.mxu1 %v995_v54 }
 0x351   :  { %2874 = vmatpush3.msra.mxu1 %v995_v54 }
 0x393   :  { %v2847_v27 = vpop.f32.mrf.mxu0 }
 0x395   :  { %v701_v57 = vpop.f32.mrf.mxu0 }
 0x407   :  { %v2854_v58 = vpop.f32.mrf.mxu0 }
 0x408   :  { %957 = vrot.lane.b32.xlu0 %v2854_v58, %s3106_s25 }
 0x409   :  { %v782_v48 = vpop.f32.mrf.mxu0 }
 0x40a   :  { %955 = vrot.lane.b32.xlu1 %v782_v48, %s3106_s25 }
 0x40c   :  { %v2861_v61 = vpop.f32.mrf.mxu1 }
 0x40d   :  { %965 = vrot.lane.b32.xlu0 %v2861_v61, %s3107_s26 }
 0x40e   :  { %v863_v53 = vpop.f32.mrf.mxu1 }
 0x40f   :  { %963 = vrot.lane.b32.xlu1 %v863_v53, %s3107_s26 }
 0x410   :  { %v2868_v60 = vpop.f32.mrf.mxu0 }
 0x411   :  { %992 = vrot.lane.b32.xlu0 %v3160_v4, %s3105_s1 }
 0x412   :  { %v944_v62 = vpop.f32.mrf.mxu0 }
 0x413   :  { %971 = vrot.lane.b32.xlu1 %v944_v62, %s3108_s27 }
 0x417   :  { %973 = vrot.lane.b32.xlu1 %v2868_v60, %s3108_s27 }
 0x47a   :  { %v958_v63 = vpop.permute.xlu0 %957 }
 0x47b   :  { %v978_v16 = vsel %vm183_vm1, %v2847_v27, %v958_v63 }
 0x47c   :  { %v956_v59 = vpop.permute.xlu1 %955 }
 0x47d   :  { %v977_v7 = vsel %vm183_vm1, %v701_v57, %v956_v59 }
 0x47f   :  { %v966_v6 = vpop.permute.xlu0 %965 }
 0x480   :  { %v980_v17 = vsel %vm540_vm3, %v978_v16, %v966_v6 }
 0x481   :  { %v964_v8 = vpop.permute.xlu1 %963 }
 0x482   :  { %v979_v10 = vsel %vm540_vm3, %v977_v7, %v964_v8 }
 0x483   :  { %v993_v9 = vpop.permute.xlu0 %992 }
 0x484   :  { %2875 = vmatprep.subr.mxu1 %v993_v9 }
 0x485   :  { %v972_v12 = vpop.permute.xlu1 %971  ;;  %2876 = vmatpush3.msra.mxu1 %v993_v9 }
 0x486   :  { %v982_v15 = vsel %vm981_vm11, %v979_v10, %v972_v12 }
 0x487   :  { %2877 = vmatprep.mubr.msk.f32.mxu1 %vm41_vm0, %v982_v15 }
 0x489   :  { %v974_v18 = vpop.permute.xlu1 %973 }
 0x48a   :  { %v983_v19 = vsel %vm981_vm11, %v980_v17, %v974_v18 }
 0x48b   :  { %2878 = vmatmul.mubr.msk.f32.vlgmr.msra.gmra.mxu1 %vm41_vm0, %v983_v19 }
 0x54b   :  { %v2879_v25 = vpop.f32.mrf.mxu1 }
 0x54c   :  { %v1082_v22 = vadd.f32 %v2879_v25, %v3380_v20 }
 0x54d   :  { %v1076_v26 = vpop.f32.mrf.mxu1 }
 0x54e   :  { %v1077_v24 = vadd.f32 %v1076_v26, %v3380_v20  ;;  %v1086_v28 = vadd.f32 %v1082_v22, %v3167_v5  ;;  %v142_v5 = vadd.f32 %v3253_v33, %v3198_v14 }
 0x550   :  { %v1090_v29 = vsel %vm41_vm0, %v1086_v28, 0.0  ;;  %v1085_v30 = vadd.f32 %v1077_v24, %v3145_v2  ;;  %v152_v2 = vadd.f32 %v3257_v35, %v3198_v14 }
 0x551   :  { %1091 = vadd.xlane.f32.xlu1 %v1090_v29 }
 0x552   :  { %v1087_v31 = vsel %vm41_vm0, %v1085_v30, 0.0 }
 0x553   :  { %1088 = vadd.xlane.f32.xlu0 %v1087_v31 }
 0x562   :  { %1132 = vrot.lane.b32.xlu1 %v3134_v0, %s3109_s28  ;;  %v137_v0 = vadd.f32 %v3255_v34, %v3198_v14 }
 0x566   :  { %1128 = vrot.lane.b32.xlu1 %v3151_v3, %s3109_s28  ;;  %v147_v3 = vadd.f32 %v3264_v37, %v3198_v14 }
 0x56a   :  { %1121 = vrot.lane.b32.xlu1 %v3394_v39, %s3109_s28 }
 0x56e   :  { %1253 = vrot.lane.b32.xlu1 %v152_v2, %s3103_s7 }
 0x572   :  { %1249 = vrot.lane.b32.xlu1 %v142_v5, %s3103_s7 }
 0x576   :  { %1247 = vrot.lane.b32.xlu1 %v137_v0, %s3103_s7 }
 0x57a   :  { %1269 = vrot.lane.b32.xlu1 %v152_v2, %s3104_s8 }
 0x57e   :  { %1267 = vrot.lane.b32.xlu1 %v147_v3, %s3104_s8 }
 0x582   :  { %1265 = vrot.lane.b32.xlu1 %v142_v5, %s3104_s8 }
 0x586   :  { %1263 = vrot.lane.b32.xlu1 %v137_v0, %s3104_s8 }
 0x5da   :  { %v1092_v13 = vpop.xlane.xlu1 %1091 }
 0x5db   :  { %v1095_v33 = vmul.f32 0.03125, %v1092_v13 }
 0x5dc   :  { %v1089_v35 = vpop.xlane.xlu0 %1088 }
 0x5dd   :  { %v1097_v40 = vsub.f32 %v1086_v28, %v1095_v33  ;;  %v1094_v41 = vmul.f32 0.03125, %v1089_v35 }
 0x5de   :  { %v1133_v42 = vpop.permute.xlu1 %1132 }
 0x5df   :  { %v1096_v34 = vsub.f32 %v1085_v30, %v1094_v41  ;;  %v1099_v43 = vmul.f32 %v1097_v40, %v1097_v40  ;;  %2880 = vmatprep.subr.mxu0 %v1133_v42 }
 0x5e0   :  { %2881 = vmatpush3.msra.mxu0 %v1133_v42 }
 0x5e1   :  { %v1103_v44 = vsel %vm41_vm0, %v1099_v43, 0.0  ;;  %v1098_v47 = vmul.f32 %v1096_v34, %v1096_v34 }
 0x5e2   :  { %v1129_v37 = vpop.permute.xlu1 %1128  ;;  %1104 = vadd.xlane.f32.xlu0 %v1103_v44 }
 0x5e3   :  { %v1100_v51 = vsel %vm41_vm0, %v1098_v47, 0.0 }
 0x5e6   :  { %v1122_v52 = vpop.permute.xlu1 %1121  ;;  %1101 = vadd.xlane.f32.xlu0 %v1100_v51 }
 0x5ea   :  { %v1254_v23 = vpop.permute.xlu1 %1253 }
 0x5eb   :  { %1382 = vrot.lane.b32.xlu1 %v1254_v23, %s3109_s28 }
 0x5fc   :  { %1130 = vrot.lane.b32.xlu0 %v3139_v1, %s3109_s28  ;;  %v1250_v1 = vpop.permute.xlu1 %1249 }
 0x600   :  { %1126 = vrot.lane.b32.xlu0 %v3160_v4, %s3109_s28  ;;  %v1248_v4 = vpop.permute.xlu1 %1247 }
 0x604   :  { %1251 = vrot.lane.b32.xlu0 %v147_v3, %s3103_s7  ;;  %v1270_v54 = vpop.permute.xlu1 %1269 }
 0x608   :  { %1139 = vrot.lane.b32.xlu0 %v3198_v14, %s3109_s28  ;;  %v1268_v14 = vpop.permute.xlu1 %1267 }
 0x60c   :  { %1261 = vrot.lane.b32.xlu0 %v152_v2, %s3102_s0  ;;  %v3431_v48 = vpop.permute.xlu1 %1265 }
 0x610   :  { %1259 = vrot.lane.b32.xlu0 %v147_v3, %s3102_s0  ;;  %v3433_v63 = vpop.permute.xlu1 %1263 }
 0x614   :  { %1257 = vrot.lane.b32.xlu0 %v142_v5, %s3102_s0 }
 0x618   :  { %1255 = vrot.lane.b32.xlu0 %v137_v0, %s3102_s0 }
 0x61c   :  { %1285 = vrot.lane.b32.xlu0 %v152_v2, %s3109_s28 }
 0x620   :  { %1283 = vrot.lane.b32.xlu0 %v147_v3, %s3109_s28 }
 0x624   :  { %1281 = vrot.lane.b32.xlu0 %v142_v5, %s3109_s28 }
 0x628   :  { %1279 = vrot.lane.b32.xlu0 %v137_v0, %s3109_s28 }
 0x65d   :  { %v3435_v6 = vpop.permute.xlu1 %1382 }
 0x66b   :  { %v1105_v27 = vpop.xlane.xlu0 %1104 }
 0x66c   :  { %v1107_v57 = vmul.f32 0.03125, %v1105_v27 }
 0x66e   :  { %v1109_v58 = vadd.f32 1e-05, %v1107_v57 }
 0x66f   :  { %v1102_v61 = vpop.xlane.xlu0 %1101 }
 0x670   :  { %3053 = vrsqrt.f32 %v1109_v58  ;;  %v1106_v53 = vmul.f32 0.03125, %v1102_v61 }
 0x672   :  { %v1108_v60 = vadd.f32 1e-05, %v1106_v53 }
 0x673   :  { %v1131_v62 = vpop.permute.xlu0 %1130 }
 0x674   :  { %3055 = vrsqrt.f32 %v1108_v60  ;;  %2882 = vmatprep.subr.mxu0 %v1131_v62 }
 0x675   :  { %2883 = vmatpush3.msra.mxu0 %v1131_v62 }
 0x676   :  { %2884 = vmatprep.subr.mxu0 %v1129_v37 }
 0x677   :  { %2885 = vmatpush3.msra.mxu0 %v1129_v37  ;;  %v1127_v59 = vpop.permute.xlu0 %1126 }
 0x678   :  { %2886 = vmatprep.subr.mxu0 %v1127_v59 }
 0x679   :  { %2887 = vmatpush3.msra.mxu0 %v1127_v59 }
 0x67a   :  { %2902 = vmatprep.subr.msk.mxu0 %vm183_vm1, %v3435_v6 }
 0x67b   :  { %v1252_v8 = vpop.permute.xlu0 %1251 }
 0x67c   :  { %1380 = vrot.lane.b32.xlu1 %v1252_v8, %s3109_s28 }
 0x67d   :  { %v3054_v9 = vpop.eup %3053 }
 0x67e   :  { %v1113_v10 = vmul.f32 %v3054_v9, %v1097_v40 }
 0x67f   :  { %v1140_v7 = vpop.permute.xlu0 %1139 }
 0x680   :  { %1378 = vrot.lane.b32.xlu1 %v1250_v1, %s3109_s28  ;;  %v1119_v17 = vmul.f32 %v3394_v39, %v1113_v10 }
 0x681   :  { %v3056_v12 = vpop.eup %3055 }
 0x682   :  { %v1112_v15 = vmul.f32 %v3056_v12, %v1096_v34  ;;  %v3447_v25 = vadd.f32 %v1122_v52, %v1119_v17 }
 0x683   :  { %v1262_v16 = vpop.permute.xlu0 %1261 }
 0x684   :  { %1376 = vrot.lane.b32.xlu1 %v1248_v4, %s3109_s28  ;;  %1479 = vrot.lane.b32.xlu0 %v1262_v16, %s3109_s28  ;;  %v1118_v18 = vmul.f32 %v3394_v39, %v1112_v15 }
 0x686   :  { %v3445_v19 = vadd.f32 %v1122_v52, %v1118_v18 }
 0x687   :  { %v1260_v21 = vpop.permute.xlu0 %1259 }
 0x688   :  { %2888 = vmatprep.mubr.msk.f32.mxu0 %vm41_vm0, %v3445_v19  ;;  %1576 = vrot.lane.b32.xlu1 %v1270_v54, %s3109_s28 }
 0x689   :  { %1477 = vrot.lane.b32.xlu0 %v1260_v21, %s3109_s28  ;;  %2889 = vmatmul.mubr.msk.f32.vlgmr.msra.gmra.mxu0 %vm41_vm0, %v3447_v25 }
 0x68a   :  { %2903 = vmatpush3.xpose.msk.msra.mxu0 %vm183_vm1, %v3435_v6 }
 0x68b   :  { %v1258_v22 = vpop.permute.xlu0 %1257 }
 0x68c   :  { %1574 = vrot.lane.b32.xlu1 %v1268_v14, %s3109_s28 }
 0x68f   :  { %v1256_v26 = vpop.permute.xlu0 %1255 }
 0x693   :  { %v3458_v24 = vpop.permute.xlu0 %1285 }
 0x694   :  { %2891 = vmatprep.subr.msk.mxu1 %vm183_vm1, %v3458_v24 }
 0x695   :  { %2892 = vmatpush3.xpose.msk.msra.mxu1 %vm183_vm1, %v3458_v24 }
 0x697   :  { %v3464_v28 = vpop.permute.xlu0 %1283 }
 0x698   :  { %2893 = vmatprep.subr.msk.mxu1 %vm183_vm1, %v3464_v28 }
 0x699   :  { %2894 = vmatpush3.xpose.msk.msra.mxu1 %vm183_vm1, %v3464_v28 }
 0x69b   :  { %v3470_v29 = vpop.permute.xlu0 %1281 }
 0x69c   :  { %2895 = vmatprep.subr.msk.mxu1 %vm183_vm1, %v3470_v29 }
 0x69d   :  { %2896 = vmatpush3.xpose.msk.msra.mxu1 %vm183_vm1, %v3470_v29 }
 0x69f   :  { %v3476_v30 = vpop.permute.xlu0 %1279 }
 0x6a0   :  { %2897 = vmatprep.subr.msk.mxu1 %vm183_vm1, %v3476_v30 }
 0x6a1   :  { %2898 = vmatpush3.xpose.msk.msra.mxu1 %vm183_vm1, %v3476_v30 }
 0x6ee   :  { %v3482_v31 = vpop.permute.xlu1 %1380 }
 0x6ef   :  { %2904 = vmatprep.subr.msk.mxu0 %vm183_vm1, %v3482_v31 }
 0x6f0   :  { %2905 = vmatpush3.xpose.msk.msra.mxu0 %vm183_vm1, %v3482_v31 }
 0x6f2   :  { %v3488_v32 = vpop.permute.xlu1 %1378 }
 0x6f3   :  { %2906 = vmatprep.subr.msk.mxu0 %vm183_vm1, %v3488_v32 }
 0x6f4   :  { %2907 = vmatpush3.xpose.msk.msra.mxu0 %vm183_vm1, %v3488_v32 }
 0x6f6   :  { %v3494_v39 = vpop.permute.xlu1 %1376  ;;  %v3496_v2 = vpop.permute.xlu0 %1479 }
 0x6f7   :  { %2908 = vmatprep.subr.msk.mxu0 %vm183_vm1, %v3494_v39  ;;  %2913 = vmatprep.subr.msk.mxu1 %vm183_vm1, %v3496_v2 }
 0x6f8   :  { %2909 = vmatpush3.xpose.msk.msra.mxu0 %vm183_vm1, %v3494_v39 }
 0x6fa   :  { %v3504_v5 = vpop.permute.xlu1 %1576 }
 0x6fb   :  { %2924 = vmatprep.subr.msk.mxu0 %vm183_vm1, %v3504_v5  ;;  %v3514_v41 = vpop.permute.xlu0 %1477 }
 0x6fe   :  { %v3530_v42 = vpop.permute.xlu1 %1574 }
 0x749   :  { %v2890_v0 = vpop.f32.mrf.mxu0 }
 0x74a   :  { %v1220_v3 = vadd.f32 %v2890_v0, %v1140_v7 }
 0x74b   :  { %v1214_v13 = vpop.f32.mrf.mxu0 }
 0x74c   :  { %v1215_v33 = vadd.f32 %v1214_v13, %v1140_v7  ;;  %1227 = vrot.lane.b32.xlu1 %v1220_v3, %s3103_s7  ;;  %v1272_v40 = vmul.f32 0.17677669, %v1220_v3 }
 0x74e   :  { %1225 = vrot.lane.b32.xlu0 %v1215_v33, %s3103_s7  ;;  %v1271_v35 = vmul.f32 0.17677669, %v1215_v33 }
 0x750   :  { %1572 = vrot.lane.b32.xlu1 %v3431_v48, %s3109_s28  ;;  %2899 = vmatprep.mubr.msk.f32.mxu1 %vm183_vm1, %v1271_v35 }
 0x751   :  { %2900 = vmatmul.mubr.msk.f32.vlgmr.msra.gmra.mxu1 %vm183_vm1, %v1272_v40 }
 0x752   :  { %2914 = vmatpush3.xpose.msk.msra.mxu1 %vm183_vm1, %v3496_v2  ;;  %1475 = vrot.lane.b32.xlu0 %v1258_v22, %s3109_s28 }
 0x753   :  { %2915 = vmatprep.subr.msk.mxu1 %vm183_vm1, %v3514_v41 }
 0x754   :  { %1233 = vrot.lane.b32.xlu1 %v1220_v3, %s3102_s0 }
 0x756   :  { %2916 = vmatpush3.xpose.msk.msra.mxu1 %vm183_vm1, %v3514_v41  ;;  %1473 = vrot.lane.b32.xlu0 %v1256_v26, %s3109_s28 }
 0x758   :  { %1231 = vrot.lane.b32.xlu1 %v1215_v33, %s3102_s0 }
 0x75a   :  { %1570 = vrot.lane.b32.xlu0 %v3433_v63, %s3109_s28 }
 0x75c   :  { %1239 = vrot.lane.b32.xlu1 %v1220_v3, %s3104_s8 }
 0x75e   :  { %1237 = vrot.lane.b32.xlu0 %v1215_v33, %s3104_s8 }
 0x7be   :  { %v1228_v34 = vpop.permute.xlu1 %1227 }
 0x7bf   :  { %v1274_v47 = vmul.f32 0.17677669, %v1228_v34 }
 0x7c0   :  { %v1226_v43 = vpop.permute.xlu0 %1225 }
 0x7c1   :  { %v1273_v44 = vmul.f32 0.17677669, %v1226_v43 }
 0x7c2   :  { %v3532_v37 = vpop.permute.xlu1 %1572 }
 0x7c3   :  { %2910 = vmatprep.mubr.msk.f32.mxu0 %vm183_vm1, %v1273_v44 }
 0x7c4   :  { %2911 = vmatmul.mubr.msk.f32.vlgmr.msra.gmra.mxu0 %vm183_vm1, %v1274_v47  ;;  %v3536_v51 = vpop.permute.xlu0 %1475 }
 0x7c5   :  { %2925 = vmatpush3.xpose.msk.msra.mxu0 %vm183_vm1, %v3504_v5  ;;  %2917 = vmatprep.subr.msk.mxu1 %vm183_vm1, %v3536_v51 }
 0x7c6   :  { %2926 = vmatprep.subr.msk.mxu0 %vm183_vm1, %v3530_v42  ;;  %v1234_v52 = vpop.permute.xlu1 %1233  ;;  %2918 = vmatpush3.xpose.msk.msra.mxu1 %vm183_vm1, %v3536_v51 }
 0x7c7   :  { %v1276_v54 = vmul.f32 0.17677669, %v1234_v52 }
 0x7c8   :  { %v3546_v23 = vpop.permute.xlu0 %1473 }
 0x7c9   :  { %2927 = vmatpush3.xpose.msk.msra.mxu0 %vm183_vm1, %v3530_v42  ;;  %2919 = vmatprep.subr.msk.mxu1 %vm183_vm1, %v3546_v23 }
 0x7ca   :  { %2928 = vmatprep.subr.msk.mxu0 %vm183_vm1, %v3532_v37  ;;  %v1232_v1 = vpop.permute.xlu1 %1231  ;;  %2920 = vmatpush3.xpose.msk.msra.mxu1 %vm183_vm1, %v3546_v23 }
 0x7cb   :  { %v1275_v4 = vmul.f32 0.17677669, %v1232_v1  ;;  %2935 = vmatprep.subr.mxu1 %v3458_v24 }
 0x7cc   :  { %v3557_v14 = vpop.permute.xlu0 %1570 }
 0x7cd   :  { %2929 = vmatpush3.xpose.msk.msra.mxu0 %vm183_vm1, %v3532_v37  ;;  %2921 = vmatprep.mubr.msk.f32.mxu1 %vm183_vm1, %v1275_v4 }
 0x7ce   :  { %2930 = vmatprep.subr.msk.mxu0 %vm183_vm1, %v3557_v14  ;;  %2922 = vmatmul.mubr.msk.f32.vlgmr.msra.gmra.mxu1 %vm183_vm1, %v1276_v54  ;;  %v1240_v27 = vpop.permute.xlu1 %1239 }
 0x7cf   :  { %2936 = vmatpush3.msra.mxu1 %v3458_v24  ;;  %v1278_v48 = vmul.f32 0.17677669, %v1240_v27 }
 0x7d0   :  { %2937 = vmatprep.subr.mxu1 %v3464_v28  ;;  %v1238_v57 = vpop.permute.xlu0 %1237 }
 0x7d1   :  { %2931 = vmatpush3.xpose.msk.msra.mxu0 %vm183_vm1, %v3557_v14  ;;  %2938 = vmatpush3.msra.mxu1 %v3464_v28  ;;  %v1277_v58 = vmul.f32 0.17677669, %v1238_v57 }
 0x7d2   :  { %2939 = vmatprep.subr.mxu1 %v3470_v29  ;;  %2946 = vmatprep.subr.mxu0 %v3435_v6 }
 0x7d3   :  { %2940 = vmatpush3.msra.mxu1 %v3470_v29  ;;  %2932 = vmatprep.mubr.msk.f32.mxu0 %vm183_vm1, %v1277_v58 }
 0x7d4   :  { %2941 = vmatprep.subr.mxu1 %v3476_v30  ;;  %2933 = vmatmul.mubr.msk.f32.vlgmr.msra.gmra.mxu0 %vm183_vm1, %v1278_v48 }
 0x7d5   :  { %2942 = vmatpush3.msra.mxu1 %v3476_v30  ;;  %2947 = vmatpush3.msra.mxu0 %v3435_v6 }
 0x7d6   :  { %2948 = vmatprep.subr.mxu0 %v3482_v31  ;;  %2957 = vmatprep.subr.mxu1 %v3496_v2 }
 0x7d7   :  { %2949 = vmatpush3.msra.mxu0 %v3482_v31 }
 0x7d8   :  { %2950 = vmatprep.subr.mxu0 %v3488_v32 }
 0x7d9   :  { %2951 = vmatpush3.msra.mxu0 %v3488_v32 }
 0x7da   :  { %2952 = vmatprep.subr.mxu0 %v3494_v39 }
 0x7db   :  { %2953 = vmatpush3.msra.mxu0 %v3494_v39 }
 0x7dc   :  { %2968 = vmatprep.subr.mxu0 %v3504_v5 }
 0x811   :  { %v2901_v61 = vpop.f32.mrf.mxu1 }
 0x812   :  { %1677 = vrot.lane.b32.xlu1 %v2901_v61, %s3107_s26 }
 0x813   :  { %v1367_v53 = vpop.f32.mrf.mxu1 }
 0x814   :  { %1675 = vrot.lane.b32.xlu0 %v1367_v53, %s3107_s26 }
 0x884   :  { %v2912_v60 = vpop.f32.mrf.mxu0  ;;  %v1678_v7 = vpop.permute.xlu1 %1677 }
 0x885   :  { %1681 = vrot.lane.b32.xlu1 %v2912_v60, %s3107_s26  ;;  %v1700_v12 = vsel %vm525_vm2, -1e+09, %v1678_v7 }
 0x886   :  { %v1464_v62 = vpop.f32.mrf.mxu0  ;;  %v1676_v9 = vpop.permute.xlu0 %1675  ;;  %v1711_v16 = vsel %vm1707_vm12, %v1700_v12, -inf }
 0x887   :  { %1679 = vrot.lane.b32.xlu0 %v1464_v62, %s3107_s26  ;;  %v1699_v10 = vsel %vm524_vm4, -1e+09, %v1676_v9 }
 0x888   :  { %v1708_v15 = vsel %vm1707_vm12, %v1699_v10, -inf }
 0x88e   :  { %v2923_v63 = vpop.f32.mrf.mxu1 }
 0x88f   :  { %1685 = vrot.lane.b32.xlu1 %v2923_v63, %s3107_s26 }
 0x890   :  { %v1561_v59 = vpop.f32.mrf.mxu1 }
 0x891   :  { %1683 = vrot.lane.b32.xlu0 %v1561_v59, %s3107_s26 }
 0x894   :  { %v2934_v6 = vpop.f32.mrf.mxu0 }
 0x895   :  { %1689 = vrot.lane.b32.xlu1 %v2934_v6, %s3107_s26 }
 0x896   :  { %v1658_v8 = vpop.f32.mrf.mxu0 }
 0x897   :  { %1687 = vrot.lane.b32.xlu0 %v1658_v8, %s3107_s26 }
 0x8b6   :  { %1709 = vmax.xlane.f32.xlu0 %v1708_v15 }
 0x8b9   :  { %1712 = vmax.xlane.f32.xlu1 %v1711_v16 }
 0x8f7   :  { %v1682_v17 = vpop.permute.xlu1 %1681 }
 0x8f8   :  { %v1702_v18 = vsel %vm527_vm5, -1e+09, %v1682_v17 }
 0x8f9   :  { %v1680_v21 = vpop.permute.xlu0 %1679  ;;  %v1717_v22 = vsel %vm1707_vm12, %v1702_v18, -inf }
 0x8fa   :  { %v1701_v38 = vsel %vm526_vm6, -1e+09, %v1680_v21  ;;  %1718 = vmax.xlane.f32.xlu0 %v1717_v22 }
 0x8fb   :  { %v1714_v36 = vsel %vm1707_vm12, %v1701_v38, -inf }
 0x8fe   :  { %1715 = vmax.xlane.f32.xlu0 %v1714_v36 }
 0x901   :  { %v1686_v26 = vpop.permute.xlu1 %1685 }
 0x902   :  { %v1704_v24 = vsel %vm529_vm7, -1e+09, %v1686_v26 }
 0x903   :  { %v1684_v28 = vpop.permute.xlu0 %1683  ;;  %v1723_v29 = vsel %vm1707_vm12, %v1704_v24, -inf }
 0x904   :  { %v1703_v45 = vsel %vm528_vm8, -1e+09, %v1684_v28  ;;  %1724 = vmax.xlane.f32.xlu0 %v1723_v29 }
 0x905   :  { %v1720_v30 = vsel %vm1707_vm12, %v1703_v45, -inf }
 0x906   :  { %1721 = vmax.xlane.f32.xlu1 %v1720_v30 }
 0x907   :  { %v1690_v46 = vpop.permute.xlu1 %1689 }
 0x908   :  { %v1706_v31 = vsel %vm531_vm9, -1e+09, %v1690_v46 }
 0x909   :  { %v1688_v32 = vpop.permute.xlu0 %1687  ;;  %v1729_v39 = vsel %vm1707_vm12, %v1706_v31, -inf }
 0x90a   :  { %v1705_v49 = vsel %vm530_vm10, -1e+09, %v1688_v32  ;;  %1730 = vmax.xlane.f32.xlu0 %v1729_v39 }
 0x90b   :  { %v1726_v0 = vsel %vm1707_vm12, %v1705_v49, -inf }
 0x90c   :  { %1727 = vmax.xlane.f32.xlu1 %v1726_v0 }
 0x93f   :  { %v1710_v50 = vpop.xlane.xlu0 %1709 }
 0x940   :  { %v1732_v3 = vsub.f32 %v1699_v10, %v1710_v50 }
 0x942   :  { %v1740_v13 = vmul.f32 1.442695, %v1732_v3  ;;  %v1713_v33 = vpop.xlane.xlu1 %1712 }
 0x943   :  { %v1733_v35 = vsub.f32 %v1700_v12, %v1713_v33 }
 0x944   :  { %3057 = vpow2.f32 %v1740_v13 }
 0x945   :  { %v1742_v40 = vmul.f32 1.442695, %v1733_v35 }
 0x947   :  { %3059 = vpow2.f32 %v1742_v40 }
 0x951   :  { %v3618_v55 = vpop.eup %3057 }
 0x952   :  { %1764 = vrot.lane.b32.xlu1 %v3618_v55, %s3102_s0 }
 0x954   :  { %v3622_v34 = vpop.eup %3059 }
 0x955   :  { %1766 = vrot.lane.b32.xlu0 %v3622_v34, %s3102_s0 }
 0x983   :  { %v1719_v56 = vpop.xlane.xlu0 %1718 }
 0x984   :  { %v1735_v43 = vsub.f32 %v1702_v18, %v1719_v56 }
 0x986   :  { %v1746_v44 = vmul.f32 1.442695, %v1735_v43 }
 0x987   :  { %v1716_v47 = vpop.xlane.xlu0 %1715 }
 0x988   :  { %3061 = vpow2.f32 %v1746_v44  ;;  %v1734_v52 = vsub.f32 %v1701_v38, %v1716_v47 }
 0x98a   :  { %v1744_v1 = vmul.f32 1.442695, %v1734_v52 }
 0x98c   :  { %3063 = vpow2.f32 %v1744_v1 }
 0x98d   :  { %v1725_v4 = vpop.xlane.xlu0 %1724 }
 0x98e   :  { %v1737_v54 = vsub.f32 %v1704_v24, %v1725_v4 }
 0x98f   :  { %v1722_v27 = vpop.xlane.xlu1 %1721 }
 0x990   :  { %v1750_v57 = vmul.f32 1.442695, %v1737_v54  ;;  %v1736_v58 = vsub.f32 %v1703_v45, %v1722_v27 }
 0x992   :  { %3065 = vpow2.f32 %v1750_v57  ;;  %v1748_v48 = vmul.f32 1.442695, %v1736_v58 }
 0x993   :  { %v1731_v61 = vpop.xlane.xlu0 %1730 }
 0x994   :  { %3067 = vpow2.f32 %v1748_v48  ;;  %v1739_v53 = vsub.f32 %v1706_v31, %v1731_v61 }
 0x995   :  { %v3062_v60 = vpop.eup %3061  ;;  %v1728_v62 = vpop.xlane.xlu1 %1727 }
 0x996   :  { %v1754_v63 = vmul.f32 1.442695, %v1739_v53  ;;  %v1738_v59 = vsub.f32 %v1705_v49, %v1728_v62  ;;  %1770 = vrot.lane.b32.xlu1 %v3062_v60, %s3102_s0 }
 0x998   :  { %3069 = vpow2.f32 %v1754_v63  ;;  %v1752_v6 = vmul.f32 1.442695, %v1738_v59  ;;  %v3097_v63 = vld [vmem:[%s3785_s2 + $0x30] sm:$0xff] }
 0x999   :  { %v3064_v8 = vpop.eup %3063 }
 0x99a   :  { %3071 = vpow2.f32 %v1752_v6  ;;  %1768 = vrot.lane.b32.xlu1 %v3064_v8, %s3102_s0 }
 0x99f   :  { %v3066_v9 = vpop.eup %3065 }
 0x9a0   :  { %1774 = vrot.lane.b32.xlu1 %v3066_v9, %s3102_s0 }
 0x9a1   :  { %v3068_v7 = vpop.eup %3067 }
 0x9a2   :  { %1772 = vrot.lane.b32.xlu0 %v3068_v7, %s3102_s0 }
 0x9a5   :  { %v3630_v10 = vpop.eup %3069 }
 0x9a6   :  { %1778 = vrot.lane.b32.xlu1 %v3630_v10, %s3102_s0 }
 0x9a7   :  { %v3634_v12 = vpop.eup %3071 }
 0x9a8   :  { %1776 = vrot.lane.b32.xlu0 %v3634_v12, %s3102_s0 }
 0x9c4   :  { %v1765_v15 = vpop.permute.xlu1 %1764 }
 0x9c5   :  { %v1788_v16 = vsel %vm41_vm0, %v1765_v15, 0.0 }
 0x9c7   :  { %1789 = vadd.xlane.f32.xlu0 %v1788_v16  ;;  %v1767_v17 = vpop.permute.xlu0 %1766 }
 0x9c8   :  { %v1791_v18 = vsel %vm41_vm0, %v1767_v17, 0.0  ;;  %v3100_v17 = vld [vmem:[%s3785_s2] sm:$0xff] }
 0x9ca   :  { %1792 = vadd.xlane.f32.xlu1 %v1791_v18 }
 0xa08   :  { %v1771_v21 = vpop.permute.xlu1 %1770 }
 0xa09   :  { %v1797_v22 = vsel %vm41_vm0, %v1771_v21, 0.0 }
 0xa0a   :  { %1798 = vadd.xlane.f32.xlu0 %v1797_v22 }
 0xa0c   :  { %v1769_v38 = vpop.permute.xlu1 %1768 }
 0xa0d   :  { %v1794_v36 = vsel %vm41_vm0, %v1769_v38, 0.0 }
 0xa0e   :  { %1795 = vadd.xlane.f32.xlu0 %v1794_v36 }
 0xa12   :  { %v1775_v26 = vpop.permute.xlu1 %1774 }
 0xa13   :  { %v1803_v24 = vsel %vm41_vm0, %v1775_v26, 0.0 }
 0xa14   :  { %1804 = vadd.xlane.f32.xlu0 %v1803_v24  ;;  %v1773_v28 = vpop.permute.xlu0 %1772 }
 0xa15   :  { %v1800_v29 = vsel %vm41_vm0, %v1773_v28, 0.0 }
 0xa16   :  { %1801 = vadd.xlane.f32.xlu1 %v1800_v29 }
 0xa18   :  { %v1779_v45 = vpop.permute.xlu1 %1778 }
 0xa19   :  { %v1809_v30 = vsel %vm41_vm0, %v1779_v45, 0.0 }
 0xa1a   :  { %1810 = vadd.xlane.f32.xlu0 %v1809_v30  ;;  %v1777_v46 = vpop.permute.xlu0 %1776 }
 0xa1b   :  { %v1806_v31 = vsel %vm41_vm0, %v1777_v46, 0.0 }
 0xa1c   :  { %1807 = vadd.xlane.f32.xlu1 %v1806_v31 }
 0xa50   :  { %v1790_v32 = vpop.xlane.xlu0 %1789 }
 0xa51   :  { %3073 = vrcp.f32 %v1790_v32 }
 0xa53   :  { %v1793_v39 = vpop.xlane.xlu1 %1792 }
 0xa54   :  { %3075 = vrcp.f32 %v1793_v39 }
 0xa5e   :  { %v3074_v49 = vpop.eup %3073 }
 0xa5f   :  { %v1820_v0 = vmul.f32 %v3074_v49, %v3618_v55 }
 0xa61   :  { %v3076_v50 = vpop.eup %3075  ;;  %1830 = vrot.lane.b32.xlu1 %v1820_v0, %s3102_s0 }
 0xa62   :  { %v1821_v3 = vmul.f32 %v3076_v50, %v3622_v34 }
 0xa64   :  { %1832 = vrot.lane.b32.xlu0 %v1821_v3, %s3102_s0 }
 0xa93   :  { %v1799_v13 = vpop.xlane.xlu0 %1798 }
 0xa94   :  { %3077 = vrcp.f32 %v1799_v13 }
 0xa97   :  { %v1796_v33 = vpop.xlane.xlu0 %1795 }
 0xa98   :  { %3079 = vrcp.f32 %v1796_v33 }
 0xa9d   :  { %v1805_v35 = vpop.xlane.xlu0 %1804 }
 0xa9e   :  { %3081 = vrcp.f32 %v1805_v35 }
 0xa9f   :  { %v1802_v40 = vpop.xlane.xlu1 %1801 }
 0xaa0   :  { %3083 = vrcp.f32 %v1802_v40 }
 0xaa1   :  { %v3078_v56 = vpop.eup %3077 }
 0xaa2   :  { %v1823_v43 = vmul.f32 %v3078_v56, %v3062_v60 }
 0xaa3   :  { %v1811_v44 = vpop.xlane.xlu0 %1810 }
 0xaa4   :  { %3085 = vrcp.f32 %v1811_v44  ;;  %1921 = vrot.lane.b32.xlu1 %v1823_v43, %s3102_s0 }
 0xaa5   :  { %v3080_v55 = vpop.eup %3079  ;;  %v1808_v47 = vpop.xlane.xlu1 %1807 }
 0xaa6   :  { %3087 = vrcp.f32 %v1808_v47  ;;  %v1822_v34 = vmul.f32 %v3080_v55, %v3064_v8 }
 0xaa8   :  { %1919 = vrot.lane.b32.xlu1 %v1822_v34, %s3102_s0 }
 0xaab   :  { %v3082_v52 = vpop.eup %3081 }
 0xaac   :  { %v1825_v1 = vmul.f32 %v3082_v52, %v3066_v9 }
 0xaad   :  { %v3084_v4 = vpop.eup %3083 }
 0xaae   :  { %2010 = vrot.lane.b32.xlu1 %v1825_v1, %s3102_s0  ;;  %v1824_v54 = vmul.f32 %v3084_v4, %v3068_v7  ;;  %v35_v1 = vld [vmem:[%s3785_s2 + $0x38] sm:$0xff]  ;;  %v33_v4 = vld [vmem:[%s3785_s2 + $0x28] sm:$0xff] }
 0xab0   :  { %2008 = vrot.lane.b32.xlu0 %v1824_v54, %s3102_s0  ;;  %v3735_v54 = vld [vmem:[%s3785_s2 + $0x40] sm:$0x7f] }
 0xab1   :  { %v3086_v27 = vpop.eup %3085 }
 0xab2   :  { %v1827_v57 = vmul.f32 %v3086_v27, %v3630_v10 }
 0xab3   :  { %v3088_v58 = vpop.eup %3087 }
 0xab4   :  { %2099 = vrot.lane.b32.xlu1 %v1827_v57, %s3102_s0  ;;  %v1826_v48 = vmul.f32 %v3088_v58, %v3634_v12  ;;  %v31_v57 = vld [vmem:[%s3785_s2 + $0x18] sm:$0xff]  ;;  %v29_v58 = vld [vmem:[%s3785_s2 + $0x8] sm:$0xff] }
 0xab6   :  { %2097 = vrot.lane.b32.xlu0 %v1826_v48, %s3102_s0 }
 0xaba   :  { %2220 = vrot.lane.b32.xlu0 %v3097_v63, %s3110_s4 }
 0xad3   :  { %v1831_v61 = vpop.permute.xlu1 %1830 }
 0xad4   :  { %2943 = vmatprep.mubr.msk.f32.mxu1 %vm41_vm0, %v1831_v61 }
 0xad6   :  { %v1833_v53 = vpop.permute.xlu0 %1832 }
 0xad7   :  { %2944 = vmatmul.mubr.msk.f32.vlgmr.msra.gmra.mxu1 %vm41_vm0, %v1833_v53 }
 0xad8   :  { %2958 = vmatpush3.msra.mxu1 %v3496_v2  ;;  %v3098_v2 = vld [vmem:[%s3785_s2 + $0x20] sm:$0xff] }
 0xad9   :  { %2959 = vmatprep.subr.mxu1 %v3514_v41  ;;  %2218 = vrot.lane.b32.xlu1 %v3098_v2, %s3110_s4 }
 0xada   :  { %2960 = vmatpush3.msra.mxu1 %v3514_v41  ;;  %v3099_v41 = vld [vmem:[%s3785_s2 + $0x10] sm:$0xff] }
 0xadb   :  { %2961 = vmatprep.subr.mxu1 %v3536_v51 }
 0xadc   :  { %2962 = vmatpush3.msra.mxu1 %v3536_v51 }
 0xadd   :  { %2963 = vmatprep.subr.mxu1 %v3546_v23  ;;  %2216 = vrot.lane.b32.xlu1 %v3099_v41, %s3110_s4 }
 0xade   :  { %2964 = vmatpush3.msra.mxu1 %v3546_v23 }
 0xb16   :  { %v1922_v60 = vpop.permute.xlu1 %1921 }
 0xb1a   :  { %v1920_v62 = vpop.permute.xlu1 %1919 }
 0xb1b   :  { %2954 = vmatprep.mubr.msk.f32.mxu0 %vm41_vm0, %v1920_v62 }
 0xb1c   :  { %2955 = vmatmul.mubr.msk.f32.vlgmr.msra.gmra.mxu0 %vm41_vm0, %v1922_v60 }
 0xb1d   :  { %2969 = vmatpush3.msra.mxu0 %v3504_v5 }
 0xb1e   :  { %2970 = vmatprep.subr.mxu0 %v3530_v42 }
 0xb1f   :  { %2971 = vmatpush3.msra.mxu0 %v3530_v42 }
 0xb20   :  { %2972 = vmatprep.subr.mxu0 %v3532_v37  ;;  %v2011_v23 = vpop.permute.xlu1 %2010 }
 0xb21   :  { %2973 = vmatpush3.msra.mxu0 %v3532_v37 }
 0xb22   :  { %2974 = vmatprep.subr.mxu0 %v3557_v14  ;;  %v2009_v51 = vpop.permute.xlu0 %2008 }
 0xb23   :  { %2975 = vmatpush3.msra.mxu0 %v3557_v14  ;;  %2965 = vmatprep.mubr.msk.f32.mxu1 %vm41_vm0, %v2009_v51 }
 0xb24   :  { %2966 = vmatmul.mubr.msk.f32.vlgmr.msra.gmra.mxu1 %vm41_vm0, %v2011_v23  ;;  %2990 = vmatprep.subr.mxu0 %v35_v1 }
 0xb26   :  { %v2100_v59 = vpop.permute.xlu1 %2099 }
 0xb28   :  { %v2098_v5 = vpop.permute.xlu0 %2097 }
 0xb29   :  { %2976 = vmatprep.mubr.msk.f32.mxu0 %vm41_vm0, %v2098_v5 }
 0xb2a   :  { %2977 = vmatmul.mubr.msk.f32.vlgmr.msra.gmra.mxu0 %vm41_vm0, %v2100_v59 }
 0xb2b   :  { %2991 = vmatpush3.msra.mxu0 %v35_v1 }
 0xb2c   :  { %v2221_v42 = vpop.permute.xlu0 %2220  ;;  %2992 = vmatprep.subr.mxu0 %v33_v4 }
 0xb2d   :  { %2979 = vmatprep.subr.mxu1 %v2221_v42  ;;  %2993 = vmatpush3.msra.mxu0 %v33_v4 }
 0xb2e   :  { %2980 = vmatpush3.msra.mxu1 %v2221_v42  ;;  %2994 = vmatprep.subr.mxu0 %v31_v57 }
 0xb2f   :  { %2995 = vmatpush3.msra.mxu0 %v31_v57 }
 0xb30   :  { %2996 = vmatprep.subr.mxu0 %v29_v58 }
 0xb31   :  { %2997 = vmatpush3.msra.mxu0 %v29_v58 }
 0xb4b   :  { %v2219_v37 = vpop.permute.xlu1 %2218 }
 0xb4c   :  { %2981 = vmatprep.subr.mxu1 %v2219_v37 }
 0xb4d   :  { %2982 = vmatpush3.msra.mxu1 %v2219_v37 }
 0xb4f   :  { %v2217_v6 = vpop.permute.xlu1 %2216 }
 0xb50   :  { %2983 = vmatprep.subr.mxu1 %v2217_v6 }
 0xb51   :  { %2984 = vmatpush3.msra.mxu1 %v2217_v6 }
 0xb97   :  { %v2945_v8 = vpop.f32.mrf.mxu1 }
 0xb99   :  { %v1908_v9 = vpop.f32.mrf.mxu1 }
 0xbdc   :  { %v2956_v14 = vpop.f32.mrf.mxu0 }
 0xbdd   :  { %2188 = vrot.lane.b32.xlu0 %v2956_v14, %s3106_s25 }
 0xbde   :  { %v1997_v12 = vpop.f32.mrf.mxu0 }
 0xbe4   :  { %v2967_v7 = vpop.f32.mrf.mxu1 }
 0xbe5   :  { %2196 = vrot.lane.b32.xlu0 %v2967_v7, %s3107_s26 }
 0xbe6   :  { %v2086_v10 = vpop.f32.mrf.mxu1 }
 0xbe7   :  { %2194 = vrot.lane.b32.xlu1 %v2086_v10, %s3107_s26  ;;  %v2353_v10 = vsub.s32 2, %v3189_v11 }
 0xbe9   :  { %2186 = vrot.lane.b32.xlu0 %v1997_v12, %s3106_s25  ;;  %v2354_v12 = vrot.slane %v3735_v54, %v2353_v10 }
 0xbea   :  { %v2978_v15 = vpop.f32.mrf.mxu0 }
 0xbec   :  { %v2175_v16 = vpop.f32.mrf.mxu0 }
 0xbed   :  { %2202 = vrot.lane.b32.xlu1 %v2175_v16, %s3108_s27  ;;  %2214 = vrot.lane.b32.xlu0 %v3100_v17, %s3110_s4 }
 0xbf1   :  { %2204 = vrot.lane.b32.xlu1 %v2978_v15, %s3108_s27  ;;  %2227 = vrot.lane.b32.xlu0 %v3380_v20, %s3109_s28 }
 0xc4f   :  { %v2189_v18 = vpop.permute.xlu0 %2188 }
 0xc50   :  { %v2209_v20 = vsel %vm183_vm1, %v2945_v8, %v2189_v18 }
 0xc57   :  { %v2197_v21 = vpop.permute.xlu0 %2196 }
 0xc58   :  { %v2211_v45 = vsel %vm540_vm3, %v2209_v20, %v2197_v21 }
 0xc59   :  { %v2195_v22 = vpop.permute.xlu1 %2194 }
 0xc5b   :  { %v2187_v38 = vpop.permute.xlu0 %2186 }
 0xc5c   :  { %v2208_v36 = vsel %vm183_vm1, %v1908_v9, %v2187_v38  ;;  %v2440_v38 = vsub.s32 3, %v3189_v11 }
 0xc5d   :  { %v2210_v24 = vsel %vm540_vm3, %v2208_v36, %v2195_v22 }
 0xc5e   :  { %v2441_v36 = vrot.slane %v3735_v54, %v2440_v38 }
 0xc5f   :  { %v2203_v26 = vpop.permute.xlu1 %2202  ;;  %v2215_v28 = vpop.permute.xlu0 %2214 }
 0xc60   :  { %v3707_v29 = vsel %vm981_vm11, %v2210_v24, %v2203_v26  ;;  %2985 = vmatprep.subr.mxu1 %v2215_v28 }
 0xc61   :  { %2987 = vmatprep.mubr.msk.f32.mxu1 %vm41_vm0, %v3707_v29  ;;  %2986 = vmatpush3.msra.mxu1 %v2215_v28 }
 0xc63   :  { %v2205_v30 = vpop.permute.xlu1 %2204  ;;  %v2228_v31 = vpop.permute.xlu0 %2227 }
 0xc64   :  { %v3714_v46 = vsel %vm981_vm11, %v2211_v45, %v2205_v30 }
 0xc65   :  { %2988 = vmatmul.mubr.msk.f32.vlgmr.msra.gmra.mxu1 %vm41_vm0, %v3714_v46 }
 0xd25   :  { %v2989_v32 = vpop.f32.mrf.mxu1 }
 0xd26   :  { %v2308_v39 = vadd.f32 %v2989_v32, %v2228_v31 }
 0xd27   :  { %v2302_v49 = vpop.f32.mrf.mxu1 }
 0xd28   :  { %v2303_v0 = vadd.f32 %v2302_v49, %v2228_v31  ;;  %v2312_v50 = vadd.f32 %v2308_v39, %v3447_v25  ;;  %v2574_v39 = vsub.s32 6, %v3189_v11 }
 0xd2a   :  { %v2311_v3 = vadd.f32 %v2303_v0, %v3445_v19  ;;  %v2316_v13 = vsel %vm41_vm0, %v2312_v50, 0.0  ;;  %v2341_v19 = vsub.s32 5, %v3189_v11  ;;  %v2575_v49 = vrot.slane %v3735_v54, %v2574_v39 }
 0xd2b   :  { %2317 = vadd.xlane.f32.xlu0 %v2316_v13 }
 0xd2c   :  { %v2313_v33 = vsel %vm41_vm0, %v2311_v3, 0.0  ;;  %v2342_v27 = vrot.slane %v3735_v54, %v2341_v19 }
 0xd2d   :  { %2314 = vadd.xlane.f32.xlu1 %v2313_v33 }
 0xdb4   :  { %v2318_v35 = vpop.xlane.xlu0 %2317 }
 0xdb5   :  { %v2320_v40 = vmul.f32 0.03125, %v2318_v35 }
 0xdb6   :  { %v2315_v56 = vpop.xlane.xlu1 %2314 }
 0xdb7   :  { %v2322_v43 = vsub.f32 %v2312_v50, %v2320_v40  ;;  %v2319_v44 = vmul.f32 0.03125, %v2315_v56 }
 0xdb9   :  { %v2321_v55 = vsub.f32 %v2311_v3, %v2319_v44  ;;  %v2324_v47 = vmul.f32 %v2322_v43, %v2322_v43 }
 0xdbb   :  { %v2328_v34 = vsel %vm41_vm0, %v2324_v47, 0.0  ;;  %v2323_v52 = vmul.f32 %v2321_v55, %v2321_v55 }
 0xdbc   :  { %2329 = vadd.xlane.f32.xlu1 %v2328_v34 }
 0xdbd   :  { %v2325_v25 = vsel %vm41_vm0, %v2323_v52, 0.0 }
 0xdbe   :  { %2326 = vadd.xlane.f32.xlu0 %v2325_v25 }
 0xdcd   :  { %2452 = vrot.lane.b32.xlu1 %v35_v1, %s3105_s1 }
 0xdd1   :  { %2450 = vrot.lane.b32.xlu1 %v33_v4, %s3105_s1 }
 0xdd4   :  { %2346 = vrot.lane.b32.xlu0 %v2342_v27, %s3109_s28 }
 0xdd5   :  { %2446 = vrot.lane.b32.xlu1 %v29_v58, %s3105_s1 }
 0xdd8   :  { %2448 = vrot.lane.b32.xlu0 %v31_v57, %s3105_s1 }
 0xe45   :  { %v2330_v48 = vpop.xlane.xlu1 %2329 }
 0xe46   :  { %v2332_v61 = vmul.f32 0.03125, %v2330_v48 }
 0xe47   :  { %v2327_v53 = vpop.xlane.xlu0 %2326 }
 0xe48   :  { %v2334_v60 = vadd.f32 1e-05, %v2332_v61  ;;  %v2331_v62 = vmul.f32 0.03125, %v2327_v53 }
 0xe49   :  { %v2453_v63 = vpop.permute.xlu1 %2452 }
 0xe4a   :  { %3089 = vrsqrt.f32 %v2334_v60  ;;  %v2333_v2 = vadd.f32 1e-05, %v2331_v62  ;;  %3001 = vmatprep.subr.msk.mxu1 %vm2454_vm13, %v2453_v63 }
 0xe4b   :  { %3002 = vmatpush3.xpose.msk.msra.mxu1 %vm2454_vm13, %v2453_v63  ;;  %v2347_v41 = vpop.permute.xlu0 %2346 }
 0xe4c   :  { %3091 = vrsqrt.f32 %v2333_v2 }
 0xe4d   :  { %v2451_v51 = vpop.permute.xlu1 %2450 }
 0xe4e   :  { %3003 = vmatprep.subr.msk.mxu1 %vm2454_vm13, %v2451_v51 }
 0xe4f   :  { %3004 = vmatpush3.xpose.msk.msra.mxu1 %vm2454_vm13, %v2451_v51  ;;  %v2449_v23 = vpop.permute.xlu0 %2448 }
 0xe50   :  { %3005 = vmatprep.subr.msk.mxu1 %vm2454_vm13, %v2449_v23 }
 0xe51   :  { %v2447_v7 = vpop.permute.xlu1 %2446 }
 0xe53   :  { %3006 = vmatpush3.xpose.msk.msra.mxu1 %vm2454_vm13, %v2449_v23 }
 0xe54   :  { %3007 = vmatprep.subr.msk.mxu1 %vm2454_vm13, %v2447_v7 }
 0xe57   :  { %v3090_v5 = vpop.eup %3089  ;;  %3008 = vmatpush3.xpose.msk.msra.mxu1 %vm2454_vm13, %v2447_v7 }
 0xe58   :  { %v2338_v59 = vmul.f32 %v3090_v5, %v2322_v43 }
 0xe59   :  { %v3092_v42 = vpop.eup %3091 }
 0xe5a   :  { %v2337_v37 = vmul.f32 %v3092_v42, %v2321_v55  ;;  %v2344_v6 = vmul.f32 %v2342_v27, %v2338_v59 }
 0xe5c   :  { %v2343_v14 = vmul.f32 %v2342_v27, %v2337_v37  ;;  %v2350_v9 = vadd.f32 %v2347_v41, %v2344_v6 }
 0xe5e   :  { %v2349_v8 = vadd.f32 %v2347_v41, %v2343_v14 }
 0xe60   :  { %2998 = vmatprep.mubr.msk.f32.mxu0 %vm41_vm0, %v2349_v8 }
 0xe61   :  { %2999 = vmatmul.mubr.msk.f32.vlgmr.msra.gmra.mxu0 %vm41_vm0, %v2350_v9 }
 0xf21   :  { %v3000_v15 = vpop.f32.mrf.mxu0 }
 0xf22   :  { %v2433_v16 = vadd.f32 %v3000_v15, %v2354_v12 }
 0xf23   :  { %v2427_v17 = vpop.f32.mrf.mxu0 }
 0xf24   :  { %v2428_v18 = vadd.f32 %v2427_v17, %v2354_v12  ;;  %v2437_v22 = vmax.f32 %v2433_v16, 0.0 }
 0xf26   :  { %v2436_v21 = vmax.f32 %v2428_v18, 0.0 }
 0xf28   :  { %3009 = vmatprep.mubr.msk.f32.mxu1 %vm2454_vm13, %v2436_v21 }
 0xf29   :  { %3010 = vmatmul.mubr.msk.f32.vlgmr.msra.gmra.mxu1 %vm2454_vm13, %v2437_v22 }
 0xfe9   :  { %v3011_v26 = vpop.f32.mrf.mxu1 }
 0xfea   :  { %v2541_v24 = vadd.f32 %v3011_v26, %v2441_v36 }
 0xfeb   :  { %v2535_v28 = vpop.f32.mrf.mxu1 }
 0xfec   :  { %v2545_v20 = vadd.f32 %v2541_v24, %v2350_v9  ;;  %v2536_v45 = vadd.f32 %v2535_v28, %v2441_v36 }
 0xfee   :  { %v2544_v30 = vadd.f32 %v2536_v45, %v2349_v8  ;;  %v2549_v31 = vsel %vm41_vm0, %v2545_v20, 0.0 }
 0xfef   :  { %2550 = vadd.xlane.f32.xlu1 %v2549_v31 }
 0xff0   :  { %v2546_v32 = vsel %vm41_vm0, %v2544_v30, 0.0 }
 0xff1   :  { %2547 = vadd.xlane.f32.xlu0 %v2546_v32 }
0x1000   :  { %2579 = vrot.lane.b32.xlu1 %v2575_v49, %s3109_s28 }
0x1004   :  { %2586 = vrot.lane.b32.xlu1 %v3714_v46, %s3110_s4 }
0x1078   :  { %v2551_v0 = vpop.xlane.xlu1 %2550 }
0x1079   :  { %v2553_v50 = vmul.f32 0.03125, %v2551_v0 }
0x107a   :  { %v2548_v3 = vpop.xlane.xlu0 %2547 }
0x107b   :  { %v2552_v13 = vmul.f32 0.03125, %v2548_v3  ;;  %v2555_v33 = vsub.f32 %v2545_v20, %v2553_v50 }
0x107c   :  { %v2580_v54 = vpop.permute.xlu1 %2579 }
0x107d   :  { %v2554_v35 = vsub.f32 %v2544_v30, %v2552_v13  ;;  %v2557_v43 = vmul.f32 %v2555_v33, %v2555_v33 }
0x107f   :  { %v2556_v40 = vmul.f32 %v2554_v35, %v2554_v35  ;;  %v2561_v11 = vsel %vm41_vm0, %v2557_v43, 0.0 }
0x1080   :  { %v2587_v60 = vpop.permute.xlu1 %2586 }
0x1081   :  { %v2558_v56 = vsel %vm41_vm0, %v2556_v40, 0.0 }
0x1082   :  { %2559 = vadd.xlane.f32.xlu0 %v2558_v56 }
0x1086   :  { %2562 = vadd.xlane.f32.xlu0 %v2561_v11 }
0x109c   :  { %2584 = vrot.lane.b32.xlu0 %v3707_v29, %s3110_s4 }
0x110b   :  { %v2560_v44 = vpop.xlane.xlu0 %2559 }
0x110c   :  { %v2564_v55 = vmul.f32 0.03125, %v2560_v44 }
0x110e   :  { %v2566_v46 = vadd.f32 1e-05, %v2564_v55 }
0x110f   :  { %v2563_v47 = vpop.xlane.xlu0 %2562 }
0x1110   :  { %3093 = vrsqrt.f32 %v2566_v46  ;;  %v2565_v34 = vmul.f32 0.03125, %v2563_v47 }
0x1112   :  { %v2567_v52 = vadd.f32 1e-05, %v2565_v34 }
0x1113   :  { %v2585_v58 = vpop.permute.xlu0 %2584 }
0x1114   :  { %3095 = vrsqrt.f32 %v2567_v52 }
0x111d   :  { %v3094_v25 = vpop.eup %3093 }
0x111e   :  { %v2570_v19 = vmul.f32 %v3094_v25, %v2554_v35 }
0x1120   :  { %v2576_v1 = vmul.f32 %v2575_v49, %v2570_v19 }
0x1121   :  { %v3096_v4 = vpop.eup %3095 }
0x1122   :  { %v2571_v27 = vmul.f32 %v3096_v4, %v2555_v33  ;;  %v2582_v57 = vadd.f32 %v2580_v54, %v2576_v1 }
0x1124   :  { %v2577_v48 = vmul.f32 %v2575_v49, %v2571_v27  ;;  %v2590_v61 = vsel %vm41_vm0, %v2582_v57, %v2585_v58 }
0x1125   :  { %v2592_v29 = vsel %vm2454_vm13, %v2590_v61, 0.0 }
0x1126   :  { %v2583_v53 = vadd.f32 %v2580_v54, %v2577_v48  ;;  %2594 = vst [vmem:[%s3788_s3] sm:$0xff] %v2592_v29 }
0x1128   :  { %v2591_v62 = vsel %vm41_vm0, %v2583_v53, %v2587_v60 }
0x1129   :  { %v2593_v63 = vsel %vm2454_vm13, %v2591_v62, 0.0 }
0x112a   :  { %2595 = vst [vmem:[%s3788_s3 + $0x8] sm:$0xff] %v2593_v63 }

</bundles_post_ra>
